<compile_context>
chip_gen: v6e
topology: v6e:2x2x1
jax: 0.10.0
libtpu: 0.0.40
codegen_flags: <defaults>
</compile_context>

<pallas_src>
import jax
import jax.numpy as jnp
from jax.experimental import pallas as pl
from jax.experimental.pallas import tpu as pltpu


_EPS = 1e-5
_LAYER_DIMS = [(352, 1024), (1024, 1024), (1024, 1024), (1024, 1024),
               (1024, 1024), (1024, 100), (100, 4)]
N_LAYERS = len(_LAYER_DIMS)
PAD = 1024                     # padded feature width (lane-dense)
IN_DIM = _LAYER_DIMS[0][0]     # 352
OUT_DIM = _LAYER_DIMS[-1][1]   # 4


# ----------------------------------------------------------------------------
# Fused kernel: one grid step == one layer.  Activations stay in VMEM scratch.
# ----------------------------------------------------------------------------
def _mlp_kernel(x_ref, w_ref, s_ref, o_ref, act_ref):
    layer = pl.program_id(0)
    last = pl.num_programs(0) - 1

    # Load the (padded) network input into the resident activation buffer once.
    @pl.when(layer == 0)
    def _():
        act_ref[...] = x_ref[...]

    h = act_ref[...]                                   # (B, 1024) f32, VMEM resident
    # bf16 x bf16 matmul on the MXU with f32 accumulation.
    y = jnp.dot(h.astype(jnp.bfloat16), w_ref[...],
                preferred_element_type=jnp.float32)
    y = y + s_ref[...]                                 # folded bias + BN shift, (1, 1024)

    @pl.when(layer < last)
    def _():
        act_ref[...] = jnp.maximum(y, 0.0)             # hidden layer: ReLU (dropout = id)

    @pl.when(layer == last)
    def _():
        o_ref[...] = y                                 # fc7: plain linear, store result


def chi_player_forward(w_stack, s_stack, x):
    """Fused forward pass. w_stack: (7,1024,1024) bf16, s_stack: (7,1,1024) f32."""
    B = x.shape[0]
    x_pad = jnp.zeros((B, PAD), jnp.float32).at[:, :IN_DIM].set(x)

    out = pl.pallas_call(
        _mlp_kernel,
        out_shape=jax.ShapeDtypeStruct((B, PAD), jnp.float32),
        grid_spec=pltpu.PrefetchScalarGridSpec(
            num_scalar_prefetch=0,
            grid=(N_LAYERS,),
            in_specs=[
                # network input: constant block index -> fetched once, resident
                pl.BlockSpec((B, PAD), lambda l: (0, 0)),
                # per-layer weight: auto double-buffered across the layer grid
                pl.BlockSpec((None, PAD, PAD), lambda l: (l, 0, 0)),
                # per-layer folded shift vector
                pl.BlockSpec((None, 1, PAD), lambda l: (l, 0, 0)),
            ],
            out_specs=pl.BlockSpec((B, PAD), lambda l: (0, 0)),
            scratch_shapes=[pltpu.VMEM((B, PAD), jnp.float32)],   # resident activations
        ),
        compiler_params=pltpu.CompilerParams(
            dimension_semantics=("arbitrary",),   # layers form a sequential chain
        ),
    )(x_pad, w_stack, s_stack)
    return out[:, :OUT_DIM]


# ----------------------------------------------------------------------------
# Deterministic parameter construction + offline folding (Linear + BN eval)
# ----------------------------------------------------------------------------
def init_folded_params(key):
    w_stack = jnp.zeros((N_LAYERS, PAD, PAD), jnp.float32)
    s_stack = jnp.zeros((N_LAYERS, 1, PAD), jnp.float32)
    for i, (fan_in, fan_out) in enumerate(_LAYER_DIMS):
        key, kw, kb, kg, kbeta, km, kv = jax.random.split(key, 7)
        bound = 1.0 / (fan_in ** 0.5)
        w = jax.random.uniform(kw, (fan_in, fan_out), jnp.float32, -bound, bound)
        b = jax.random.uniform(kb, (fan_out,), jnp.float32, -bound, bound)
        if i < N_LAYERS - 1:   # layers followed by BatchNorm1d (eval / running stats)
            gamma = jax.random.uniform(kg, (fan_out,), jnp.float32, 0.5, 1.5)
            beta = 0.1 * jax.random.normal(kbeta, (fan_out,), jnp.float32)
            running_mean = 0.1 * jax.random.normal(km, (fan_out,), jnp.float32)
            running_var = jax.random.uniform(kv, (fan_out,), jnp.float32, 0.5, 1.5)
            scale = gamma / jnp.sqrt(running_var + _EPS)
            w_fold = w * scale[None, :]
            s_fold = b * scale + (beta - running_mean * scale)
        else:                  # fc7: plain linear
            w_fold = w
            s_fold = b
        w_stack = w_stack.at[i, :fan_in, :fan_out].set(w_fold)
        s_stack = s_stack.at[i, 0, :fan_out].set(s_fold)
    # bf16 weights: the network is HBM-bandwidth bound at small batch.
    return w_stack.astype(jnp.bfloat16), s_stack


# ----------------------------------------------------------------------------
# Pure-JAX reference mirroring the kernel's numerics (bf16 weights/activations,
# f32 accumulation) for a tight correctness check.
# ----------------------------------------------------------------------------
def chi_player_forward_ref(w_stack, s_stack, x):
    w_f32 = w_stack.astype(jnp.float32)
    B = x.shape[0]
    h = jnp.zeros((B, PAD), jnp.float32).at[:, :IN_DIM].set(x)
    for i in range(N_LAYERS):
        hb = h.astype(jnp.bfloat16).astype(jnp.float32)
        y = hb @ w_f32[i] + s_stack[i]
        h = y if i == N_LAYERS - 1 else jnp.maximum(y, 0.0)
    return h[:, :OUT_DIM]


if __name__ == "__main__":
    key = jax.random.PRNGKey(0)
    k_params, k_x = jax.random.split(key)
    w_stack, s_stack = init_folded_params(k_params)

    batch = 8
    x = jax.random.normal(k_x, (batch, IN_DIM), jnp.float32)

    out = jax.block_until_ready(chi_player_forward(w_stack, s_stack, x))
    ref = jax.block_until_ready(chi_player_forward_ref(w_stack, s_stack, x))

    assert out.shape == (batch, OUT_DIM), out.shape
    assert jnp.allclose(out, ref, atol=1e-3, rtol=1e-3), \
        f"max abs err {jnp.max(jnp.abs(out - ref))}"
    print("KERNEL_OK")
</pallas_src>

<mosaic_0001>
module attributes {stable_mosaic.version = 11 : i64} {
  func.func @_mlp_kernel(%arg0: i32, %arg1: memref<8x1024xf32, #tpu.memory_space<vmem>>, %arg2: memref<1x1024x1024xbf16, #tpu.memory_space<vmem>>, %arg3: memref<1x1x1024xf32, #tpu.memory_space<vmem>>, %arg4: memref<8x1024xf32, #tpu.memory_space<vmem>>, %arg5: memref<8x1024xf32, #tpu.memory_space<vmem>>) attributes {dimension_semantics = [#tpu.dimension_semantics<arbitrary>], iteration_bounds = array<i64: 7>, scalar_prefetch = 0 : i64, scratch_operands = 1 : i64, tpu.core_type = #tpu.core_type<tc>, window_params = [{pipeline_mode = #tpu.pipeline_mode<synchronous>, transform_indices = @transform_0, window_bounds = array<i64: 8, 1024>}, {transform_indices = @transform_1, window_bounds = array<i64: 1, 1024, 1024>}, {transform_indices = @transform_2, window_bounds = array<i64: 1, 1, 1024>}, {pipeline_mode = #tpu.pipeline_mode<synchronous>, transform_indices = @transform_3, window_bounds = array<i64: 8, 1024>}]} {
    %c0_i32 = arith.constant 0 : i32
    %0 = arith.cmpi eq, %arg0, %c0_i32 : i32
    %1 = arith.extui %0 : i1 to i32
    %c0_i32_0 = arith.constant 0 : i32
    %2 = arith.cmpi ne, %1, %c0_i32_0 : i32
    scf.if %2 {
      %c0_11 = arith.constant 0 : index
      %c0_12 = arith.constant 0 : index
      %18 = vector.load %arg1[%c0_11, %c0_12] : memref<8x1024xf32, #tpu.memory_space<vmem>>, vector<8x1024xf32>
      %c0_13 = arith.constant 0 : index
      %c0_14 = arith.constant 0 : index
      %19 = vector.load %arg5[%c0_13, %c0_14] : memref<8x1024xf32, #tpu.memory_space<vmem>>, vector<8x1024xf32>
      tpu.vector_store %arg5[%c0_13, %c0_14], %18 {strides = array<i32>} : memref<8x1024xf32, #tpu.memory_space<vmem>>, vector<8x1024xf32>,
    } else {
    }
    %c0 = arith.constant 0 : index
    %c0_1 = arith.constant 0 : index
    %3 = vector.load %arg5[%c0, %c0_1] : memref<8x1024xf32, #tpu.memory_space<vmem>>, vector<8x1024xf32>
    %4 = arith.truncf %3 : vector<8x1024xf32> to vector<8x1024xbf16>
    %c0_2 = arith.constant 0 : index
    %c0_3 = arith.constant 0 : index
    %c0_4 = arith.constant 0 : index
    %5 = vector.load %arg2[%c0_2, %c0_3, %c0_4] : memref<1x1024x1024xbf16, #tpu.memory_space<vmem>>, vector<1x1024x1024xbf16>
    %6 = vector.shape_cast %5 : vector<1x1024x1024xbf16> to vector<1024x1024xbf16>
    %cst = arith.constant dense<0.000000e+00> : vector<8x1024xf32>
    %7 = tpu.matmul %4, %6, %cst {dimension_numbers = #tpu.dot_dimension_numbers<[1], [0], [0], [1], [0, 0, 1, 1], [], []>} : vector<8x1024xbf16>, vector<1024x1024xbf16>, vector<8x1024xf32> -> vector<8x1024xf32>
    %c0_5 = arith.constant 0 : index
    %c0_6 = arith.constant 0 : index
    %c0_7 = arith.constant 0 : index
    %8 = vector.load %arg3[%c0_5, %c0_6, %c0_7] : memref<1x1x1024xf32, #tpu.memory_space<vmem>>, vector<1x1x1024xf32>
    %9 = vector.shape_cast %8 : vector<1x1x1024xf32> to vector<1x1024xf32>
    %10 = vector.broadcast %9 : vector<1x1024xf32> to vector<8x1024xf32>
    %11 = arith.addf %7, %10 : vector<8x1024xf32>
    %c6_i32 = arith.constant 6 : i32
    %12 = arith.cmpi slt, %arg0, %c6_i32 : i32
    %13 = arith.extui %12 : i1 to i32
    %c0_i32_8 = arith.constant 0 : i32
    %14 = arith.cmpi ne, %13, %c0_i32_8 : i32
    scf.if %14 {
      %cst_11 = arith.constant 0.000000e+00 : f32
      %18 = vector.broadcast %cst_11 : f32 to vector<8x1024xf32>
      %19 = arith.maximumf %11, %18 : vector<8x1024xf32>
      %c0_12 = arith.constant 0 : index
      %c0_13 = arith.constant 0 : index
      %20 = vector.load %arg5[%c0_12, %c0_13] : memref<8x1024xf32, #tpu.memory_space<vmem>>, vector<8x1024xf32>
      tpu.vector_store %arg5[%c0_12, %c0_13], %19 {strides = array<i32>} : memref<8x1024xf32, #tpu.memory_space<vmem>>, vector<8x1024xf32>,
    } else {
    }
    %c6_i32_9 = arith.constant 6 : i32
    %15 = arith.cmpi eq, %arg0, %c6_i32_9 : i32
    %16 = arith.extui %15 : i1 to i32
    %c0_i32_10 = arith.constant 0 : i32
    %17 = arith.cmpi ne, %16, %c0_i32_10 : i32
    scf.if %17 {
      %c0_11 = arith.constant 0 : index
      %c0_12 = arith.constant 0 : index
      %18 = vector.load %arg4[%c0_11, %c0_12] : memref<8x1024xf32, #tpu.memory_space<vmem>>, vector<8x1024xf32>
      tpu.vector_store %arg4[%c0_11, %c0_12], %11 {strides = array<i32>} : memref<8x1024xf32, #tpu.memory_space<vmem>>, vector<8x1024xf32>,
    } else {
    }
    return
  }
  func.func @transform_0(%arg0: i32) -> (i32, i32) {
    %c0_i32 = arith.constant 0 : i32
    %c0_i32_0 = arith.constant 0 : i32
    %c0_i32_1 = arith.constant 0 : i32
    return %c0_i32, %c0_i32_0 : i32, i32
  }
  func.func @transform_1(%arg0: i32) -> (i32, i32, i32) {
    %c0_i32 = arith.constant 0 : i32
    %c0_i32_0 = arith.constant 0 : i32
    %c0_i32_1 = arith.constant 0 : i32
    return %arg0, %c0_i32, %c0_i32_0 : i32, i32, i32
  }
  func.func @transform_2(%arg0: i32) -> (i32, i32, i32) {
    %c0_i32 = arith.constant 0 : i32
    %c0_i32_0 = arith.constant 0 : i32
    %c0_i32_1 = arith.constant 0 : i32
    return %arg0, %c0_i32, %c0_i32_0 : i32, i32, i32
  }
  func.func @transform_3(%arg0: i32) -> (i32, i32) {
    %c0_i32 = arith.constant 0 : i32
    %c0_i32_0 = arith.constant 0 : i32
    %c0_i32_1 = arith.constant 0 : i32
    return %c0_i32, %c0_i32_0 : i32, i32
  }
}

</mosaic_0001>

<bundles_post_ra>
// kernel: tpu_custom_call.1
= control target key start
LH: loop header
LB: loop body
LE: loop exit
PB: predicated region body
PF: predicated region fallthrough
CT: control target
= control target key end

     0   :  { %8 = vsyncpa [#allocation4], 0  ;;  %s5717_s0 = inlined_call_operand.hbm [shape: f32[8,1024], index: 0, kind: input, shape index: {}]   ;;  %s5718_s1 = inlined_call_operand.hbm [shape: bf16[7,1024,1024], index: 1, kind: input, shape index: {}]   ;;  %s5719_s2 = inlined_call_operand.hbm [shape: f32[7,1,1024], index: 2, kind: input, shape index: {}]   ;;  %s5720_s3 = inlined_call_operand.hbm [shape: f32[8,1024], index: 3, kind: output, shape index: {}]  }
   0x1   :  { %9 = vsyncpa [#allocation7], 0 }
   0x2   :  { %11 = vsyncpa [#allocation7 + $0x1], 0 }
   0x3   :  { %12 = vsyncpa [#allocation5], 0  ;;  %s4928_s12 = smov 0   ;;  %s4930_s13 = smov 0  }
   0x4   :  { %s4932_s14 = smov 0   ;;  %s4934_s15 = smov 0  }
   0x5 LB: > { %s4949_s16 = sadd.s32 1, %s4900_s15   ;;  %s46_s17 = sadd.s32 1, %s4896_s14  ;;  %s4900_s15 = sphi %s4934_s15, %s5735_s15   ;;  %s4896_s14 = sphi %s4932_s14, %s5734_s14   ;;  %s4892_s13 = sphi %s4930_s13, %s5733_s13   ;;  %s4888_s12 = sphi %s4928_s12, %s5732_s12  }
   0x6   : > { %s43_s18 = ssub.s32 %s4900_s15, %s4949_s16  ;;  %p53_p0 = scmp.ne.s32.totalorder %s4896_s14, %s4892_s13 }
   0x7   : > { %p44_p1 = scmp.eq.s32.totalorder %s43_s18, 0  ;;  %p54_p2 = scmp.eq.s32.totalorder %s4900_s15, 0 }
   0x8   : > { %p4711_p3 = scmp.lt.s32.totalorder %s4900_s15, 7  ;;  %s141_s20 = sand.u32 1, %s4900_s15  }
   0x9   : > { %s4959_s19 = scalar_select %p44_p1, %s4896_s14, %s46_s17  }
   0xa   : > { %p55_p4 = por %p54_p2, %p53_p0  ;;  %s143_s21 = sand.u32 1, %s4896_s14  }
   0xb   : > { %s4156_s22 = sshll.u32 %s143_s21, 12  ;;  %s4685_s23 = sshll.u32 %s4900_s15, 16 }
   0xc   : > { %s4969_s26 = scalar_lea.hbm %s5718_s1, %s4685_s23  ;;  %s145_s27 = scalar_lea.vmem [#allocation6], %s4156_s22 }
   0xd   : > { %s152_s28 = sshll.u32 %s145_s27, 4  ;;  %p4971_p5 = pnand %p4711_p3, %p55_p4  ;;  %s4975_s28 = int_to_ptr.vmem [resolvable:$true] %s152_s28 }
   0xe   : > { %s4977_s30 = scalar_lea.sflag [#allocation7], %s141_s20  ;;  %s4752_s4 = scalar_lea.hbm %s4969_s26, 65536 }
   0xf   : > { %p4753_p6 = scmp.ne.s32.totalorder %s4969_s26, %s4752_s4  ;;  %p5721_p7 = pneg %p4971_p5 }
  0x10   : > { %s4757_s7 = scalar_lea.hbm %s5718_s1, 458752  ;;  %p4758_p10 = scmp.lt.s32.totalorder %s4969_s26, %s5718_s1 }
  0x11   : > { %p4755_p8 = pnand %p5721_p7, %p4753_p6  ;;  %p4759_p11 = scmp.lt.s32.totalorder %s4757_s7, %s4752_s4 }
  0x13   : > { %p4756_p9 = pneg %p4755_p8  ;;  %p4760_p12 = por %p4759_p11, %p4758_p10 }
  0x15   : > { %p4761_p13 = pnand %p4760_p12, %p4756_p9 }
  0x17   : > { %4764 = shalt.err (!%p4761_p13)
}
  0x18   : > { %s4765_s10 = scalar_lea.vmem %s4975_s28, 65536  ;;  %s4902_s11 = smov [#allocation6]  }
  0x19   : > { %p4766_p0 = scmp.ne.s32.totalorder %s4975_s28, %s4765_s10  ;;  %s4770_s17 = sshll.u32 %s4902_s11, 4  ;;  %s4771_s17 = int_to_ptr.vmem [resolvable:$false] %s4770_s17 }
  0x1a   : > { %s4772_s18 = scalar_lea.vmem %s4771_s17, 131072  ;;  %p4773_p3 = scmp.lt.s32.totalorder %s4975_s28, %s4771_s17 }
  0x1b   : > { %p4768_p1 = pnand %p4766_p0, %p5721_p7  ;;  %p4774_p4 = scmp.lt.s32.totalorder %s4772_s18, %s4765_s10 }
  0x1d   : > { %p4769_p2 = pneg %p4768_p1  ;;  %p4775_p6 = por %p4774_p4, %p4773_p3 }
  0x1f   : > { %p4776_p8 = pnand %p4775_p6, %p4769_p2 }
  0x21   : > { %4779 = shalt.err (!%p4776_p8)
}
  0x22   : > { %s4903_s20 = smov 512   ;;  %s4904_s22 = smov 32  }
  0x23   : > { %4706 = dma.hbm_to_vmem [thread:$0]  (!%p4971_p5), %s4969_s26, 65536, %s4975_s28, %s4977_s30, %s4903_s20, %s4903_s20, %s4904_s22  }
  0x24   : > { %s5005_s23 = sadd.s32 4294967295, %s4900_s15   ;;  %p59_p10 = scmp.ne.s32.totalorder %s4892_s13, %s4888_s12 }
  0x25   : > { %p5722_p9 = scmp.eq.s32.totalorder %s5005_s23, 0  ;;  %p4153_p11 = scmp.ge.s32.totalorder %s4900_s15, 1 }
  0x26   : > { %p117_p12 = scmp.lt.s32.totalorder %s4900_s15, 8  ;;  %s4905_s26 = smov [#allocation3]  }
  0x27   : > { %p5015_p0 = por %p5722_p9, %p59_p10  ;;  %s130_s27 = sshll.u32 %s4905_s26, 4  ;;  %s131_s27 = int_to_ptr.vmem [resolvable:$true] %s130_s27 }
  0x28   : > { %p5019_p1 = pnand %p4153_p11, %p117_p12  ;;  %s4159_s28 = sshll.u32 %s143_s21, 3 }
  0x29   : > { %s5725_s24 = scalar_select %p5015_p0, 1, 0 }
  0x2a   : > { %p4699_p2 = pneg %p5019_p1  ;;  %s4686_s12 = sshll.u32 %s4900_s15, 7 }
  0x2b   : > { %s166_s4 = scalar_lea.vmem [#allocation8], %s4159_s28  ;;  %s5033_s8 = scalar_lea.hbm %s5719_s2, %s4686_s12 }
  0x2c   : > { %s174_s5 = sshll.u32 %s166_s4, 4  ;;  %p4700_p3 = pnand %p4699_p2, %p5722_p9  ;;  %s5035_s5 = int_to_ptr.vmem [resolvable:$true] %s174_s5 }
  0x2d   : > { %s4791_s9 = scalar_lea.vmem %s131_s27, 1024  ;;  %p4799_p11 = scmp.lt.s32.totalorder %s131_s27, %s131_s27 }
  0x2e   : > { %p4782_p4 = pneg %p4700_p3  ;;  %p4792_p6 = scmp.ne.s32.totalorder %s131_s27, %s4791_s9 }
  0x2f   : > { %p4800_p12 = scmp.lt.s32.totalorder %s4791_s9, %s4791_s9 }
  0x30   : > { %p4794_p8 = pnand %p4792_p6, %p4782_p4 }
  0x31   : > { %p4801_p13 = por %p4800_p12, %p4799_p11 }
  0x32   : > { %p4795_p10 = pneg %p4794_p8 }
  0x34   : > { %p4802_p7 = pnand %p4801_p13, %p4795_p10 }
  0x36   : > { %4805 = shalt.err (!%p4802_p7)
}
  0x37   : > { %4702 = dma.hbm_to_vmem [thread:$0]  (!%p4700_p3), %s5717_s0, 1024, %s131_s27, [#allocation4]  }
  0x38   : > { %s4806_s10 = scalar_lea.hbm %s5033_s8, 128  ;;  %p5727_p9 = pneg %p4971_p5 }
  0x39   : > { %p4807_p2 = scmp.ne.s32.totalorder %s5033_s8, %s4806_s10  ;;  %s4811_s18 = scalar_lea.hbm %s5719_s2, 896 }
  0x3a   : > { %p4812_p7 = scmp.lt.s32.totalorder %s5033_s8, %s5719_s2  ;;  %p4813_p13 = scmp.lt.s32.totalorder %s4811_s18, %s4806_s10 }
  0x3b   : > { %p4809_p0 = pnand %p4807_p2, %p5727_p9 }
  0x3c   : > { %p4814_p6 = por %p4813_p13, %p4812_p7 }
  0x3d   : > { %p4810_p4 = pneg %p4809_p0 }
  0x3f   : > { %p4815_p8 = pnand %p4814_p6, %p4810_p4 }
  0x41   : > { %4818 = shalt.err (!%p4815_p8)
}
  0x42   : > { %s4819_s26 = scalar_lea.vmem %s5035_s5, 128  ;;  %s4906_s27 = smov [#allocation8]  }
  0x43   : > { %p4820_p3 = scmp.ne.s32.totalorder %s5035_s5, %s4819_s26  ;;  %s4824_s28 = sshll.u32 %s4906_s27, 4  ;;  %s4825_s28 = int_to_ptr.vmem [resolvable:$false] %s4824_s28 }
  0x44   : > { %s4826_s12 = scalar_lea.vmem %s4825_s28, 256  ;;  %p4827_p11 = scmp.lt.s32.totalorder %s5035_s5, %s4825_s28 }
  0x45   : > { %p4822_p0 = pnand %p4820_p3, %p5727_p9  ;;  %p4828_p12 = scmp.lt.s32.totalorder %s4826_s12, %s4819_s26 }
  0x47   : > { %p4823_p10 = pneg %p4822_p0  ;;  %p4829_p2 = por %p4828_p12, %p4827_p11 }
  0x49   : > { %p4830_p7 = pnand %p4829_p2, %p4823_p10 }
  0x4b   : > { %4833 = shalt.err (!%p4830_p7)
}
  0x4c   : > { %4709 = dma.hbm_to_vmem [thread:$0]  (!%p4971_p5), %s5033_s8, 128, %s5035_s5, %s4977_s30  }
  0x4d   : > { %183 = sbr.rel (%p5019_p1) target bundleno = 851 (0x353), region = 32  ;;  %p5728_p4 = scmp.eq.s32.totalorder (!%p5019_p1), %s5005_s23, 0 }
  0x52   : > { %4875 = dma.done.wait (%p5728_p4), [#allocation4], 1024   ;;  %p5729_p13 = pmov %p5728_p4 }
  0x53   : > { %s189_s4 = sand.u32 1, %s5005_s23   ;;  %s191_s6 = sand.u32 1, %s4892_s13  }
  0x54   : > { %4877 = vsyncadd (%p5729_p13), [#allocation4], 4294966272  ;;  %s4164_s7 = sshll.u32 %s191_s6, 12  ;;  %s190_s29 = scalar_lea.sflag [#allocation7], %s189_s4 }
  0x55   : > { %s5071_s9 = scalar_lea.vmem [#allocation6], %s4164_s7  ;;  %p5730_p6 = scmp.ne.s32.totalorder %s5725_s24, 0 }
  0x57   : > { %4879 = dma.done.wait (%p5730_p6), %s190_s29, 65664  }
  0x58   : > { %4881 = vsyncadd (%p5730_p6), %s190_s29, 4294901632  ;;  %s5077_s30 = sshll.u32 %s191_s6, 3  ;;  %p5731_p5 = scmp.ne.s32.totalorder %s5005_s23, 0 }
  0x59   : > { %s202_s25 = scalar_lea.vmem [#allocation8], %s5077_s30 }
  0x5a   : > { %228 = sbr.rel (%p5731_p5) target bundleno = 100 (0x64), region = 48 }
  0x5f   : > { %v229_v0 = vld [vmem:[#allocation3] sm:$0xff]  ;;  %v230_v1 = vld [vmem:[#allocation3 + $0x8] sm:$0xff]  ;;  %v231_v2 = vld [vmem:[#allocation3 + $0x10] sm:$0xff] }
  0x60   : > { %237 = vst [vmem:[#allocation2 + $0x30] sm:$0xff] %v229_v0  ;;  %238 = vst [vmem:[#allocation2] sm:$0xff] %v230_v1  ;;  %v232_v3 = vld [vmem:[#allocation3 + $0x18] sm:$0xff]  ;;  %v233_v4 = vld [vmem:[#allocation3 + $0x20] sm:$0xff] }
  0x61   : > { %239 = vst [vmem:[#allocation2 + $0x18] sm:$0xff] %v231_v2  ;;  %v234_v5 = vld [vmem:[#allocation3 + $0x28] sm:$0xff]  ;;  %240 = vst [vmem:[#allocation2 + $0x10] sm:$0xff] %v232_v3  ;;  %v235_v6 = vld [vmem:[#allocation3 + $0x30] sm:$0xff] }
  0x62   : > { %241 = vst [vmem:[#allocation2 + $0x8] sm:$0xff] %v233_v4  ;;  %242 = vst [vmem:[#allocation2 + $0x20] sm:$0xff] %v234_v5  ;;  %v236_v7 = vld [vmem:[#allocation3 + $0x38] sm:$0xff] }
  0x63   : > { %243 = vst [vmem:[#allocation2 + $0x28] sm:$0xff] %v235_v6  ;;  %244 = vst [vmem:[#allocation2 + $0x38] sm:$0xff] %v236_v7 }
  0x64 PF: > { %v317_v8 = vld [vmem:[%s5071_s9 + $0x1c0] sm:$0xff]  ;;  %p4679_p1 = scmp.ge.s32.totalorder %s5005_s23, 6 }
  0x65   : > { %v321_v9 = vld [vmem:[%s5071_s9 + $0x1e0] sm:$0xff] }
  0x66   : > { %v445_v10 = vld [vmem:[%s5071_s9 + $0x5c0] sm:$0xff]  ;;  %v4224_v11 = vcombine.high %v317_v8, %v321_v9  ;;  %v4223_v13 = vcombine.low %v317_v8, %v321_v9 }
  0x67   : > { %v449_v12 = vld [vmem:[%s5071_s9 + $0x5e0] sm:$0xff] }
  0x68   : > { %v309_v14 = vld [vmem:[%s5071_s9 + $0x180] sm:$0xff]  ;;  %v4352_v16 = vcombine.high %v445_v10, %v449_v12  ;;  %v4351_v17 = vcombine.low %v445_v10, %v449_v12  ;;  %3375 = vmatprep.subr.bf16.mxu0 %v4224_v11  ;;  %v248_v62 = vld [vmem:[#allocation2 + $0x10] sm:$0xff] }
  0x69   : > { %v313_v15 = vld [vmem:[%s5071_s9 + $0x1a0] sm:$0xff]  ;;  %3376 = vmatpush1.bf16.msra.mxu0 %v4223_v13  ;;  %v5114_v3 = vpack.c.bf16 %v248_v62, %v248_v62 }
  0x6a   : > { %v4216_v18 = vcombine.high %v309_v14, %v313_v15  ;;  %v437_v19 = vld [vmem:[%s5071_s9 + $0x580] sm:$0xff]  ;;  %3416 = vmatprep.subr.bf16.mxu1 %v4352_v16  ;;  %v4215_v26 = vcombine.low %v309_v14, %v313_v15 }
  0x6b   : > { %v441_v20 = vld [vmem:[%s5071_s9 + $0x5a0] sm:$0xff]  ;;  %3417 = vmatpush1.bf16.msra.mxu1 %v4351_v17  ;;  %3448 = vmatprep.mubr.bf16.mxu1 %v5114_v3 }
  0x6c   : > { %v301_v21 = vld [vmem:[%s5071_s9 + $0x140] sm:$0xff]  ;;  %v4344_v22 = vcombine.high %v437_v19, %v441_v20  ;;  %3377 = vmatprep.subr.bf16.mxu0 %v4216_v18  ;;  %v4343_v27 = vcombine.low %v437_v19, %v441_v20 }
  0x6d   : > { %v305_v23 = vld [vmem:[%s5071_s9 + $0x160] sm:$0xff]  ;;  %3378 = vmatpush1.bf16.msra.mxu0 %v4215_v26 }
  0x6e   : > { %v429_v24 = vld [vmem:[%s5071_s9 + $0x540] sm:$0xff]  ;;  %v4208_v28 = vcombine.high %v301_v21, %v305_v23  ;;  %3418 = vmatprep.subr.bf16.mxu1 %v4344_v22  ;;  %v4207_v34 = vcombine.low %v301_v21, %v305_v23 }
  0x6f   : > { %v433_v25 = vld [vmem:[%s5071_s9 + $0x560] sm:$0xff]  ;;  %3419 = vmatpush1.bf16.msra.mxu1 %v4343_v27 }
  0x70   : > { %v4336_v29 = vcombine.high %v429_v24, %v433_v25  ;;  %v293_v30 = vld [vmem:[%s5071_s9 + $0x100] sm:$0xff]  ;;  %3379 = vmatprep.subr.bf16.mxu0 %v4208_v28  ;;  %v4335_v35 = vcombine.low %v429_v24, %v433_v25 }
  0x71   : > { %v297_v31 = vld [vmem:[%s5071_s9 + $0x120] sm:$0xff]  ;;  %3380 = vmatpush1.bf16.msra.mxu0 %v4207_v34 }
  0x72   : > { %v421_v32 = vld [vmem:[%s5071_s9 + $0x500] sm:$0xff]  ;;  %v4200_v36 = vcombine.high %v293_v30, %v297_v31  ;;  %3420 = vmatprep.subr.bf16.mxu1 %v4336_v29  ;;  %v4199_v42 = vcombine.low %v293_v30, %v297_v31 }
  0x73   : > { %v425_v33 = vld [vmem:[%s5071_s9 + $0x520] sm:$0xff]  ;;  %3421 = vmatpush1.bf16.msra.mxu1 %v4335_v35 }
  0x74   : > { %v4328_v37 = vcombine.high %v421_v32, %v425_v33  ;;  %v285_v38 = vld [vmem:[%s5071_s9 + $0xc0] sm:$0xff]  ;;  %3381 = vmatprep.subr.bf16.mxu0 %v4200_v36  ;;  %v4327_v43 = vcombine.low %v421_v32, %v425_v33 }
  0x75   : > { %v289_v39 = vld [vmem:[%s5071_s9 + $0xe0] sm:$0xff]  ;;  %3382 = vmatpush1.bf16.msra.mxu0 %v4199_v42 }
  0x76   : > { %v413_v40 = vld [vmem:[%s5071_s9 + $0x4c0] sm:$0xff]  ;;  %v4192_v44 = vcombine.high %v285_v38, %v289_v39  ;;  %3422 = vmatprep.subr.bf16.mxu1 %v4328_v37  ;;  %v4191_v50 = vcombine.low %v285_v38, %v289_v39 }
  0x77   : > { %v417_v41 = vld [vmem:[%s5071_s9 + $0x4e0] sm:$0xff]  ;;  %3423 = vmatpush1.bf16.msra.mxu1 %v4327_v43 }
  0x78   : > { %v4320_v45 = vcombine.high %v413_v40, %v417_v41  ;;  %v277_v46 = vld [vmem:[%s5071_s9 + $0x80] sm:$0xff]  ;;  %3383 = vmatprep.subr.bf16.mxu0 %v4192_v44  ;;  %v4319_v51 = vcombine.low %v413_v40, %v417_v41 }
  0x79   : > { %v281_v47 = vld [vmem:[%s5071_s9 + $0xa0] sm:$0xff]  ;;  %3384 = vmatpush1.bf16.msra.mxu0 %v4191_v50 }
  0x7a   : > { %v405_v48 = vld [vmem:[%s5071_s9 + $0x480] sm:$0xff]  ;;  %v4184_v52 = vcombine.high %v277_v46, %v281_v47  ;;  %3424 = vmatprep.subr.bf16.mxu1 %v4320_v45  ;;  %v4183_v58 = vcombine.low %v277_v46, %v281_v47 }
  0x7b   : > { %v409_v49 = vld [vmem:[%s5071_s9 + $0x4a0] sm:$0xff]  ;;  %3425 = vmatpush1.bf16.msra.mxu1 %v4319_v51 }
  0x7c   : > { %v4312_v53 = vcombine.high %v405_v48, %v409_v49  ;;  %v269_v54 = vld [vmem:[%s5071_s9 + $0x40] sm:$0xff]  ;;  %3385 = vmatprep.subr.bf16.mxu0 %v4184_v52  ;;  %v4311_v59 = vcombine.low %v405_v48, %v409_v49 }
  0x7d   : > { %v273_v55 = vld [vmem:[%s5071_s9 + $0x60] sm:$0xff]  ;;  %3386 = vmatpush1.bf16.msra.mxu0 %v4183_v58 }
  0x7e   : > { %v397_v56 = vld [vmem:[%s5071_s9 + $0x440] sm:$0xff]  ;;  %v4176_v60 = vcombine.high %v269_v54, %v273_v55  ;;  %3426 = vmatprep.subr.bf16.mxu1 %v4312_v53  ;;  %v4175_v6 = vcombine.low %v269_v54, %v273_v55 }
  0x7f   : > { %v401_v57 = vld [vmem:[%s5071_s9 + $0x460] sm:$0xff]  ;;  %3427 = vmatpush1.bf16.msra.mxu1 %v4311_v59 }
  0x80   : > { %v246_v61 = vld [vmem:[#allocation2] sm:$0xff]  ;;  %v4304_v63 = vcombine.high %v397_v56, %v401_v57  ;;  %3387 = vmatprep.subr.bf16.mxu0 %v4176_v60  ;;  %v4303_v7 = vcombine.low %v397_v56, %v401_v57 }
  0x81   : > { %v261_v0 = vld [vmem:[%s5071_s9] sm:$0xff]  ;;  %v5112_v2 = vpack.c.bf16 %v246_v61, %v246_v61  ;;  %3388 = vmatpush1.bf16.msra.mxu0 %v4175_v6 }
  0x82   : > { %v265_v1 = vld [vmem:[%s5071_s9 + $0x20] sm:$0xff]  ;;  %3428 = vmatprep.subr.bf16.mxu1 %v4304_v63 }
  0x83   : > { %v389_v4 = vld [vmem:[%s5071_s9 + $0x400] sm:$0xff]  ;;  %3407 = vmatprep.mubr.bf16.mxu0 %v5112_v2  ;;  %v4168_v8 = vcombine.high %v261_v0, %v265_v1  ;;  %v4167_v14 = vcombine.low %v261_v0, %v265_v1  ;;  %3429 = vmatpush1.bf16.msra.mxu1 %v4303_v7 }
  0x84   : > { %v393_v5 = vld [vmem:[%s5071_s9 + $0x420] sm:$0xff] }
  0x85   : > { %v4296_v9 = vcombine.high %v389_v4, %v393_v5  ;;  %v381_v10 = vld [vmem:[%s5071_s9 + $0x3c0] sm:$0xff]  ;;  %3389 = vmatprep.subr.bf16.mxu0 %v4168_v8  ;;  %v4295_v15 = vcombine.low %v389_v4, %v393_v5 }
  0x86   : > { %v385_v11 = vld [vmem:[%s5071_s9 + $0x3e0] sm:$0xff]  ;;  %3390 = vmatpush1.bf16.msra.mxu0 %v4167_v14 }
  0x87   : > { %v509_v12 = vld [vmem:[%s5071_s9 + $0x7c0] sm:$0xff]  ;;  %v4288_v16 = vcombine.high %v381_v10, %v385_v11  ;;  %3430 = vmatprep.subr.bf16.mxu1 %v4296_v9  ;;  %v4287_v22 = vcombine.low %v381_v10, %v385_v11 }
  0x88   : > { %v513_v13 = vld [vmem:[%s5071_s9 + $0x7e0] sm:$0xff]  ;;  %3431 = vmatpush1.bf16.msra.mxu1 %v4295_v15 }
  0x89   : > { %v4416_v17 = vcombine.high %v509_v12, %v513_v13  ;;  %v373_v18 = vld [vmem:[%s5071_s9 + $0x380] sm:$0xff]  ;;  %3391 = vmatprep.subr.bf16.mxu0 %v4288_v16  ;;  %v4415_v23 = vcombine.low %v509_v12, %v513_v13 }
  0x8a   : > { %v377_v19 = vld [vmem:[%s5071_s9 + $0x3a0] sm:$0xff]  ;;  %3392 = vmatpush2.bf16.msra.mxu0 %v4287_v22 }
  0x8b   : > { %v501_v20 = vld [vmem:[%s5071_s9 + $0x780] sm:$0xff]  ;;  %v4280_v24 = vcombine.high %v373_v18, %v377_v19  ;;  %3432 = vmatprep.subr.bf16.mxu1 %v4416_v17  ;;  %v4279_v30 = vcombine.low %v373_v18, %v377_v19  ;;  %v245_v17 = vld [vmem:[#allocation2 + $0x30] sm:$0xff]  ;;  %v247_v19 = vld [vmem:[#allocation2 + $0x18] sm:$0xff] }
  0x8c   : > { %v505_v21 = vld [vmem:[%s5071_s9 + $0x7a0] sm:$0xff]  ;;  %3433 = vmatpush2.bf16.msra.mxu1 %v4415_v23 }
  0x8d   : > { %v4408_v25 = vcombine.high %v501_v20, %v505_v21  ;;  %v365_v26 = vld [vmem:[%s5071_s9 + $0x340] sm:$0xff]  ;;  %3393 = vmatprep.subr.bf16.mxu0 %v4280_v24  ;;  %v4407_v31 = vcombine.low %v501_v20, %v505_v21  ;;  %v5158_v24 = vpack.c.bf16 %v245_v17, %v245_v17 }
  0x8e   : > { %v369_v27 = vld [vmem:[%s5071_s9 + $0x360] sm:$0xff]  ;;  %3394 = vmatpush2.bf16.msra.mxu0 %v4279_v30  ;;  %v252_v30 = vld [vmem:[#allocation2 + $0x38] sm:$0xff] }
  0x8f   : > { %v493_v28 = vld [vmem:[%s5071_s9 + $0x740] sm:$0xff]  ;;  %v4272_v32 = vcombine.high %v365_v26, %v369_v27  ;;  %3434 = vmatprep.subr.bf16.mxu1 %v4408_v25  ;;  %v4271_v38 = vcombine.low %v365_v26, %v369_v27 }
  0x90   : > { %v497_v29 = vld [vmem:[%s5071_s9 + $0x760] sm:$0xff]  ;;  %3435 = vmatpush2.bf16.msra.mxu1 %v4407_v31 }
  0x91   : > { %v4400_v33 = vcombine.high %v493_v28, %v497_v29  ;;  %v357_v34 = vld [vmem:[%s5071_s9 + $0x300] sm:$0xff]  ;;  %3395 = vmatprep.subr.bf16.mxu0 %v4272_v32  ;;  %v4399_v39 = vcombine.low %v493_v28, %v497_v29  ;;  %v5162_v28 = vpack.c.bf16 %v247_v19, %v247_v19 }
  0x92   : > { %v361_v35 = vld [vmem:[%s5071_s9 + $0x320] sm:$0xff]  ;;  %3396 = vmatpush2.bf16.msra.mxu0 %v4271_v38 }
  0x93   : > { %v485_v36 = vld [vmem:[%s5071_s9 + $0x700] sm:$0xff]  ;;  %v4264_v40 = vcombine.high %v357_v34, %v361_v35  ;;  %3436 = vmatprep.subr.bf16.mxu1 %v4400_v33  ;;  %v4263_v46 = vcombine.low %v357_v34, %v361_v35 }
  0x94   : > { %v489_v37 = vld [vmem:[%s5071_s9 + $0x720] sm:$0xff]  ;;  %3437 = vmatpush2.bf16.msra.mxu1 %v4399_v39  ;;  %v5171_v39 = vpack.c.bf16 %v252_v30, %v252_v30 }
  0x95   : > { %v4392_v41 = vcombine.high %v485_v36, %v489_v37  ;;  %v349_v42 = vld [vmem:[%s5071_s9 + $0x2c0] sm:$0xff]  ;;  %3397 = vmatprep.subr.bf16.mxu0 %v4264_v40  ;;  %v4391_v47 = vcombine.low %v485_v36, %v489_v37 }
  0x96   : > { %v353_v43 = vld [vmem:[%s5071_s9 + $0x2e0] sm:$0xff]  ;;  %3398 = vmatpush2.bf16.msra.mxu0 %v4263_v46 }
  0x97   : > { %v477_v44 = vld [vmem:[%s5071_s9 + $0x6c0] sm:$0xff]  ;;  %v4256_v48 = vcombine.high %v349_v42, %v353_v43  ;;  %3438 = vmatprep.subr.bf16.mxu1 %v4392_v41  ;;  %v4255_v54 = vcombine.low %v349_v42, %v353_v43 }
  0x98   : > { %v481_v45 = vld [vmem:[%s5071_s9 + $0x6e0] sm:$0xff]  ;;  %3439 = vmatpush2.bf16.msra.mxu1 %v4391_v47 }
  0x99   : > { %v4384_v49 = vcombine.high %v477_v44, %v481_v45  ;;  %v341_v50 = vld [vmem:[%s5071_s9 + $0x280] sm:$0xff]  ;;  %3399 = vmatprep.subr.bf16.mxu0 %v4256_v48  ;;  %v4383_v55 = vcombine.low %v477_v44, %v481_v45 }
  0x9a   : > { %v345_v51 = vld [vmem:[%s5071_s9 + $0x2a0] sm:$0xff]  ;;  %3400 = vmatpush2.bf16.msra.mxu0 %v4255_v54 }
  0x9b   : > { %v469_v52 = vld [vmem:[%s5071_s9 + $0x680] sm:$0xff]  ;;  %v4248_v56 = vcombine.high %v341_v50, %v345_v51  ;;  %3440 = vmatprep.subr.bf16.mxu1 %v4384_v49  ;;  %v4247_v62 = vcombine.low %v341_v50, %v345_v51 }
  0x9c   : > { %v473_v53 = vld [vmem:[%s5071_s9 + $0x6a0] sm:$0xff]  ;;  %3441 = vmatpush2.bf16.msra.mxu1 %v4383_v55 }
  0x9d   : > { %v4376_v57 = vcombine.high %v469_v52, %v473_v53  ;;  %v333_v58 = vld [vmem:[%s5071_s9 + $0x240] sm:$0xff]  ;;  %3401 = vmatprep.subr.bf16.mxu0 %v4248_v56  ;;  %v4375_v63 = vcombine.low %v469_v52, %v473_v53 }
  0x9e   : > { %v337_v59 = vld [vmem:[%s5071_s9 + $0x260] sm:$0xff]  ;;  %3402 = vmatpush2.bf16.msra.mxu0 %v4247_v62 }
  0x9f   : > { %v461_v60 = vld [vmem:[%s5071_s9 + $0x640] sm:$0xff]  ;;  %v4240_v0 = vcombine.high %v333_v58, %v337_v59  ;;  %3442 = vmatprep.subr.bf16.mxu1 %v4376_v57  ;;  %v4239_v8 = vcombine.low %v333_v58, %v337_v59 }
  0xa0   : > { %v465_v61 = vld [vmem:[%s5071_s9 + $0x660] sm:$0xff]  ;;  %3443 = vmatpush2.bf16.msra.mxu1 %v4375_v63 }
  0xa1   : > { %v4368_v1 = vcombine.high %v461_v60, %v465_v61  ;;  %v325_v4 = vld [vmem:[%s5071_s9 + $0x200] sm:$0xff]  ;;  %3403 = vmatprep.subr.bf16.mxu0 %v4240_v0  ;;  %v4367_v9 = vcombine.low %v461_v60, %v465_v61 }
  0xa2   : > { %v329_v5 = vld [vmem:[%s5071_s9 + $0x220] sm:$0xff]  ;;  %3404 = vmatpush2.bf16.msra.mxu0 %v4239_v8 }
  0xa3   : > { %v453_v6 = vld [vmem:[%s5071_s9 + $0x600] sm:$0xff]  ;;  %v4232_v10 = vcombine.high %v325_v4, %v329_v5  ;;  %3444 = vmatprep.subr.bf16.mxu1 %v4368_v1  ;;  %v4231_v16 = vcombine.low %v325_v4, %v329_v5 }
  0xa4   : > { %v457_v7 = vld [vmem:[%s5071_s9 + $0x620] sm:$0xff]  ;;  %3445 = vmatpush2.bf16.msra.mxu1 %v4367_v9 }
  0xa5   : > { %v4360_v11 = vcombine.high %v453_v6, %v457_v7  ;;  %v573_v12 = vld [vmem:[%s5071_s9 + $0x9c0] sm:$0xff]  ;;  %3405 = vmatprep.subr.bf16.mxu0 %v4232_v10  ;;  %v4359_v18 = vcombine.low %v453_v6, %v457_v7 }
  0xa6   : > { %v577_v13 = vld [vmem:[%s5071_s9 + $0x9e0] sm:$0xff]  ;;  %3406 = vmatpush2.bf16.msra.mxu0 %v4231_v16 }
  0xa7   : > { %v701_v14 = vld [vmem:[%s5071_s9 + $0xdc0] sm:$0xff]  ;;  %v4480_v20 = vcombine.high %v573_v12, %v577_v13  ;;  %3446 = vmatprep.subr.bf16.mxu1 %v4360_v11  ;;  %v4479_v29 = vcombine.low %v573_v12, %v577_v13 }
  0xa8   : > { %v705_v15 = vld [vmem:[%s5071_s9 + $0xde0] sm:$0xff]  ;;  %3447 = vmatpush2.bf16.msra.mxu1 %v4359_v18 }
  0xa9   : > { %v4608_v21 = vcombine.high %v701_v14, %v705_v15  ;;  %v565_v22 = vld [vmem:[%s5071_s9 + $0x980] sm:$0xff]  ;;  %3457 = vmatprep.subr.bf16.mxu0 %v4480_v20  ;;  %v4607_v31 = vcombine.low %v701_v14, %v705_v15  ;;  %3408 = vmatmul.mubr.bf16.vlgmr.msra.gmra.mxu0 %v5158_v24 }
  0xaa   : > { %v569_v23 = vld [vmem:[%s5071_s9 + $0x9a0] sm:$0xff]  ;;  %3458 = vmatpush1.bf16.msra.mxu0 %v4479_v29 }
  0xab   : > { %v693_v25 = vld [vmem:[%s5071_s9 + $0xd80] sm:$0xff]  ;;  %v4472_v32 = vcombine.high %v565_v22, %v569_v23  ;;  %3498 = vmatprep.subr.bf16.mxu1 %v4608_v21  ;;  %3449 = vmatmul.mubr.bf16.vlgmr.msra.gmra.mxu1 %v5162_v28  ;;  %v4471_v40 = vcombine.low %v565_v22, %v569_v23 }
  0xac   : > { %v697_v26 = vld [vmem:[%s5071_s9 + $0xda0] sm:$0xff]  ;;  %3499 = vmatpush1.bf16.msra.mxu1 %v4607_v31  ;;  %3530 = vmatprep.mubr.bf16.mxu1 %v5171_v39 }
  0xad   : > { %v250_v27 = vld [vmem:[#allocation2 + $0x20] sm:$0xff]  ;;  %v4600_v33 = vcombine.high %v693_v25, %v697_v26  ;;  %3459 = vmatprep.subr.bf16.mxu0 %v4472_v32  ;;  %v4599_v41 = vcombine.low %v693_v25, %v697_v26 }
  0xae   : > { %v557_v34 = vld [vmem:[%s5071_s9 + $0x940] sm:$0xff]  ;;  %v5166_v36 = vpack.c.bf16 %v250_v27, %v250_v27  ;;  %3460 = vmatpush1.bf16.msra.mxu0 %v4471_v40 }
  0xaf   : > { %v561_v35 = vld [vmem:[%s5071_s9 + $0x960] sm:$0xff]  ;;  %3500 = vmatprep.subr.bf16.mxu1 %v4600_v33 }
  0xb0   : > { %v685_v37 = vld [vmem:[%s5071_s9 + $0xd40] sm:$0xff]  ;;  %v4464_v42 = vcombine.high %v557_v34, %v561_v35  ;;  %3489 = vmatprep.mubr.bf16.mxu0 %v5166_v36  ;;  %v4463_v48 = vcombine.low %v557_v34, %v561_v35  ;;  %3501 = vmatpush1.bf16.msra.mxu1 %v4599_v41 }
  0xb1   : > { %v689_v38 = vld [vmem:[%s5071_s9 + $0xd60] sm:$0xff] }
  0xb2   : > { %v4592_v43 = vcombine.high %v685_v37, %v689_v38  ;;  %v549_v44 = vld [vmem:[%s5071_s9 + $0x900] sm:$0xff]  ;;  %3461 = vmatprep.subr.bf16.mxu0 %v4464_v42  ;;  %v4591_v49 = vcombine.low %v685_v37, %v689_v38 }
  0xb3   : > { %v553_v45 = vld [vmem:[%s5071_s9 + $0x920] sm:$0xff]  ;;  %3462 = vmatpush1.bf16.msra.mxu0 %v4463_v48 }
  0xb4   : > { %v677_v46 = vld [vmem:[%s5071_s9 + $0xd00] sm:$0xff]  ;;  %v4456_v50 = vcombine.high %v549_v44, %v553_v45  ;;  %3502 = vmatprep.subr.bf16.mxu1 %v4592_v43  ;;  %v4455_v56 = vcombine.low %v549_v44, %v553_v45 }
  0xb5   : > { %v681_v47 = vld [vmem:[%s5071_s9 + $0xd20] sm:$0xff]  ;;  %3503 = vmatpush1.bf16.msra.mxu1 %v4591_v49 }
  0xb6   : > { %v4584_v51 = vcombine.high %v677_v46, %v681_v47  ;;  %v541_v52 = vld [vmem:[%s5071_s9 + $0x8c0] sm:$0xff]  ;;  %3463 = vmatprep.subr.bf16.mxu0 %v4456_v50  ;;  %v4583_v57 = vcombine.low %v677_v46, %v681_v47 }
  0xb7   : > { %v545_v53 = vld [vmem:[%s5071_s9 + $0x8e0] sm:$0xff]  ;;  %3464 = vmatpush1.bf16.msra.mxu0 %v4455_v56 }
  0xb8   : > { %v669_v54 = vld [vmem:[%s5071_s9 + $0xcc0] sm:$0xff]  ;;  %v4448_v58 = vcombine.high %v541_v52, %v545_v53  ;;  %3504 = vmatprep.subr.bf16.mxu1 %v4584_v51  ;;  %v4447_v0 = vcombine.low %v541_v52, %v545_v53 }
  0xb9   : > { %v673_v55 = vld [vmem:[%s5071_s9 + $0xce0] sm:$0xff]  ;;  %3505 = vmatpush1.bf16.msra.mxu1 %v4583_v57 }
  0xba   : > { %v4576_v59 = vcombine.high %v669_v54, %v673_v55  ;;  %v533_v60 = vld [vmem:[%s5071_s9 + $0x880] sm:$0xff]  ;;  %3465 = vmatprep.subr.bf16.mxu0 %v4448_v58  ;;  %v4575_v1 = vcombine.low %v669_v54, %v673_v55 }
  0xbb   : > { %v537_v61 = vld [vmem:[%s5071_s9 + $0x8a0] sm:$0xff]  ;;  %3466 = vmatpush1.bf16.msra.mxu0 %v4447_v0 }
  0xbc   : > { %v661_v62 = vld [vmem:[%s5071_s9 + $0xc80] sm:$0xff]  ;;  %v4440_v4 = vcombine.high %v533_v60, %v537_v61  ;;  %3506 = vmatprep.subr.bf16.mxu1 %v4576_v59  ;;  %v4439_v10 = vcombine.low %v533_v60, %v537_v61 }
  0xbd   : > { %v665_v63 = vld [vmem:[%s5071_s9 + $0xca0] sm:$0xff]  ;;  %3507 = vmatpush1.bf16.msra.mxu1 %v4575_v1 }
  0xbe   : > { %v4568_v5 = vcombine.high %v661_v62, %v665_v63  ;;  %v525_v6 = vld [vmem:[%s5071_s9 + $0x840] sm:$0xff]  ;;  %3467 = vmatprep.subr.bf16.mxu0 %v4440_v4  ;;  %v4567_v11 = vcombine.low %v661_v62, %v665_v63 }
  0xbf   : > { %v529_v7 = vld [vmem:[%s5071_s9 + $0x860] sm:$0xff]  ;;  %3468 = vmatpush1.bf16.msra.mxu0 %v4439_v10 }
  0xc0   : > { %v653_v8 = vld [vmem:[%s5071_s9 + $0xc40] sm:$0xff]  ;;  %v4432_v12 = vcombine.high %v525_v6, %v529_v7  ;;  %3508 = vmatprep.subr.bf16.mxu1 %v4568_v5  ;;  %v4431_v18 = vcombine.low %v525_v6, %v529_v7 }
  0xc1   : > { %v657_v9 = vld [vmem:[%s5071_s9 + $0xc60] sm:$0xff]  ;;  %3509 = vmatpush1.bf16.msra.mxu1 %v4567_v11 }
  0xc2   : > { %v4560_v13 = vcombine.high %v653_v8, %v657_v9  ;;  %v517_v14 = vld [vmem:[%s5071_s9 + $0x800] sm:$0xff]  ;;  %3469 = vmatprep.subr.bf16.mxu0 %v4432_v12  ;;  %v4559_v19 = vcombine.low %v653_v8, %v657_v9 }
  0xc3   : > { %v521_v15 = vld [vmem:[%s5071_s9 + $0x820] sm:$0xff]  ;;  %3470 = vmatpush1.bf16.msra.mxu0 %v4431_v18 }
  0xc4   : > { %v645_v16 = vld [vmem:[%s5071_s9 + $0xc00] sm:$0xff]  ;;  %v4424_v20 = vcombine.high %v517_v14, %v521_v15  ;;  %3510 = vmatprep.subr.bf16.mxu1 %v4560_v13  ;;  %v4423_v27 = vcombine.low %v517_v14, %v521_v15 }
  0xc5   : > { %v649_v17 = vld [vmem:[%s5071_s9 + $0xc20] sm:$0xff]  ;;  %3511 = vmatpush1.bf16.msra.mxu1 %v4559_v19 }
  0xc6   : > { %v4552_v21 = vcombine.high %v645_v16, %v649_v17  ;;  %v637_v22 = vld [vmem:[%s5071_s9 + $0xbc0] sm:$0xff]  ;;  %3471 = vmatprep.subr.bf16.mxu0 %v4424_v20  ;;  %v4551_v29 = vcombine.low %v645_v16, %v649_v17 }
  0xc7   : > { %v641_v23 = vld [vmem:[%s5071_s9 + $0xbe0] sm:$0xff]  ;;  %3472 = vmatpush1.bf16.msra.mxu0 %v4423_v27 }
  0xc8   : > { %v765_v25 = vld [vmem:[%s5071_s9 + $0xfc0] sm:$0xff]  ;;  %v4544_v30 = vcombine.high %v637_v22, %v641_v23  ;;  %3512 = vmatprep.subr.bf16.mxu1 %v4552_v21  ;;  %v4543_v37 = vcombine.low %v637_v22, %v641_v23 }
  0xc9   : > { %v769_v26 = vld [vmem:[%s5071_s9 + $0xfe0] sm:$0xff]  ;;  %3513 = vmatpush1.bf16.msra.mxu1 %v4551_v29 }
  0xca   : > { %v4672_v31 = vcombine.high %v765_v25, %v769_v26  ;;  %v629_v32 = vld [vmem:[%s5071_s9 + $0xb80] sm:$0xff]  ;;  %3473 = vmatprep.subr.bf16.mxu0 %v4544_v30  ;;  %v4671_v38 = vcombine.low %v765_v25, %v769_v26  ;;  %v318_v30 = vld [vmem:[%s5071_s9 + $0x1c8] sm:$0xff] }
  0xcb   : > { %v633_v33 = vld [vmem:[%s5071_s9 + $0xba0] sm:$0xff]  ;;  %3474 = vmatpush2.bf16.msra.mxu0 %v4543_v37 }
  0xcc   : > { %v757_v34 = vld [vmem:[%s5071_s9 + $0xf80] sm:$0xff]  ;;  %v4536_v40 = vcombine.high %v629_v32, %v633_v33  ;;  %3514 = vmatprep.subr.bf16.mxu1 %v4672_v31  ;;  %v4535_v46 = vcombine.low %v629_v32, %v633_v33  ;;  %v322_v31 = vld [vmem:[%s5071_s9 + $0x1e8] sm:$0xff] }
  0xcd   : > { %v761_v35 = vld [vmem:[%s5071_s9 + $0xfa0] sm:$0xff]  ;;  %3515 = vmatpush2.bf16.msra.mxu1 %v4671_v38  ;;  %v446_v32 = vld [vmem:[%s5071_s9 + $0x5c8] sm:$0xff] }
  0xce   : > { %v4664_v41 = vcombine.high %v757_v34, %v761_v35  ;;  %v621_v42 = vld [vmem:[%s5071_s9 + $0xb40] sm:$0xff]  ;;  %3475 = vmatprep.subr.bf16.mxu0 %v4536_v40  ;;  %v4663_v47 = vcombine.low %v757_v34, %v761_v35  ;;  %v450_v33 = vld [vmem:[%s5071_s9 + $0x5e8] sm:$0xff]  ;;  %v4226_v40 = vcombine.high %v318_v30, %v322_v31 }
  0xcf   : > { %v625_v43 = vld [vmem:[%s5071_s9 + $0xb60] sm:$0xff]  ;;  %3476 = vmatpush2.bf16.msra.mxu0 %v4535_v46  ;;  %v249_v35 = vld [vmem:[#allocation2 + $0x8] sm:$0xff] }
  0xd0   : > { %v749_v44 = vld [vmem:[%s5071_s9 + $0xf40] sm:$0xff]  ;;  %v4528_v48 = vcombine.high %v621_v42, %v625_v43  ;;  %3516 = vmatprep.subr.bf16.mxu1 %v4664_v41  ;;  %v4527_v54 = vcombine.low %v621_v42, %v625_v43  ;;  %v251_v38 = vld [vmem:[#allocation2 + $0x28] sm:$0xff]  ;;  %v4354_v41 = vcombine.high %v446_v32, %v450_v33 }
  0xd1   : > { %v753_v45 = vld [vmem:[%s5071_s9 + $0xf60] sm:$0xff]  ;;  %3517 = vmatpush2.bf16.msra.mxu1 %v4663_v47  ;;  %v310_v42 = vld [vmem:[%s5071_s9 + $0x188] sm:$0xff]  ;;  %v5238_v47 = vpack.c.bf16 %v251_v38, %v251_v38 }
  0xd2   : > { %v4656_v49 = vcombine.high %v749_v44, %v753_v45  ;;  %v613_v50 = vld [vmem:[%s5071_s9 + $0xb00] sm:$0xff]  ;;  %3477 = vmatprep.subr.bf16.mxu0 %v4528_v48  ;;  %v4655_v55 = vcombine.low %v749_v44, %v753_v45  ;;  %v314_v43 = vld [vmem:[%s5071_s9 + $0x1a8] sm:$0xff]  ;;  %v5234_v44 = vpack.c.bf16 %v249_v35, %v249_v35  ;;  %v4225_v48 = vcombine.low %v318_v30, %v322_v31 }
  0xd3   : > { %v617_v51 = vld [vmem:[%s5071_s9 + $0xb20] sm:$0xff]  ;;  %3478 = vmatpush2.bf16.msra.mxu0 %v4527_v54  ;;  %v438_v45 = vld [vmem:[%s5071_s9 + $0x588] sm:$0xff] }
  0xd4   : > { %v741_v52 = vld [vmem:[%s5071_s9 + $0xf00] sm:$0xff]  ;;  %v4520_v56 = vcombine.high %v613_v50, %v617_v51  ;;  %3518 = vmatprep.subr.bf16.mxu1 %v4656_v49  ;;  %v4519_v62 = vcombine.low %v613_v50, %v617_v51  ;;  %v442_v46 = vld [vmem:[%s5071_s9 + $0x5a8] sm:$0xff]  ;;  %v4353_v49 = vcombine.low %v446_v32, %v450_v33  ;;  %v4218_v50 = vcombine.high %v310_v42, %v314_v43 }
  0xd5   : > { %v745_v53 = vld [vmem:[%s5071_s9 + $0xf20] sm:$0xff]  ;;  %3519 = vmatpush2.bf16.msra.mxu1 %v4655_v55  ;;  %v4346_v51 = vcombine.high %v438_v45, %v442_v46  ;;  %v430_v54 = vld [vmem:[%s5071_s9 + $0x548] sm:$0xff] }
  0xd6   : > { %v4648_v57 = vcombine.high %v741_v52, %v745_v53  ;;  %v605_v58 = vld [vmem:[%s5071_s9 + $0xac0] sm:$0xff]  ;;  %3479 = vmatprep.subr.bf16.mxu0 %v4520_v56  ;;  %v4647_v63 = vcombine.low %v741_v52, %v745_v53  ;;  %v302_v52 = vld [vmem:[%s5071_s9 + $0x148] sm:$0xff]  ;;  %v4217_v56 = vcombine.low %v310_v42, %v314_v43 }
  0xd7   : > { %v609_v59 = vld [vmem:[%s5071_s9 + $0xae0] sm:$0xff]  ;;  %3480 = vmatpush2.bf16.msra.mxu0 %v4519_v62  ;;  %v306_v53 = vld [vmem:[%s5071_s9 + $0x168] sm:$0xff] }
  0xd8   : > { %v733_v60 = vld [vmem:[%s5071_s9 + $0xec0] sm:$0xff]  ;;  %v4512_v0 = vcombine.high %v605_v58, %v609_v59  ;;  %3520 = vmatprep.subr.bf16.mxu1 %v4648_v57  ;;  %v4511_v8 = vcombine.low %v605_v58, %v609_v59  ;;  %v434_v55 = vld [vmem:[%s5071_s9 + $0x568] sm:$0xff]  ;;  %v4345_v57 = vcombine.low %v438_v45, %v442_v46  ;;  %v4210_v58 = vcombine.high %v302_v52, %v306_v53 }
  0xd9   : > { %v737_v61 = vld [vmem:[%s5071_s9 + $0xee0] sm:$0xff]  ;;  %3521 = vmatpush2.bf16.msra.mxu1 %v4647_v63  ;;  %v4338_v59 = vcombine.high %v430_v54, %v434_v55  ;;  %v422_v62 = vld [vmem:[%s5071_s9 + $0x508] sm:$0xff] }
  0xda   : > { %v4640_v1 = vcombine.high %v733_v60, %v737_v61  ;;  %v597_v4 = vld [vmem:[%s5071_s9 + $0xa80] sm:$0xff]  ;;  %3481 = vmatprep.subr.bf16.mxu0 %v4512_v0  ;;  %v4639_v9 = vcombine.low %v733_v60, %v737_v61  ;;  %v294_v60 = vld [vmem:[%s5071_s9 + $0x108] sm:$0xff]  ;;  %v4209_v0 = vcombine.low %v302_v52, %v306_v53 }
  0xdb   : > { %v601_v5 = vld [vmem:[%s5071_s9 + $0xaa0] sm:$0xff]  ;;  %3482 = vmatpush2.bf16.msra.mxu0 %v4511_v8  ;;  %v298_v61 = vld [vmem:[%s5071_s9 + $0x128] sm:$0xff] }
  0xdc   : > { %v725_v6 = vld [vmem:[%s5071_s9 + $0xe80] sm:$0xff]  ;;  %v4504_v10 = vcombine.high %v597_v4, %v601_v5  ;;  %3522 = vmatprep.subr.bf16.mxu1 %v4640_v1  ;;  %v4503_v16 = vcombine.low %v597_v4, %v601_v5  ;;  %v426_v63 = vld [vmem:[%s5071_s9 + $0x528] sm:$0xff]  ;;  %v4337_v1 = vcombine.low %v430_v54, %v434_v55  ;;  %v4202_v4 = vcombine.high %v294_v60, %v298_v61 }
  0xdd   : > { %v729_v7 = vld [vmem:[%s5071_s9 + $0xea0] sm:$0xff]  ;;  %3523 = vmatpush2.bf16.msra.mxu1 %v4639_v9  ;;  %v4330_v5 = vcombine.high %v422_v62, %v426_v63  ;;  %v414_v8 = vld [vmem:[%s5071_s9 + $0x4c8] sm:$0xff] }
  0xde   : > { %v4632_v11 = vcombine.high %v725_v6, %v729_v7  ;;  %v589_v12 = vld [vmem:[%s5071_s9 + $0xa40] sm:$0xff]  ;;  %3483 = vmatprep.subr.bf16.mxu0 %v4504_v10  ;;  %v4631_v17 = vcombine.low %v725_v6, %v729_v7  ;;  %v286_v6 = vld [vmem:[%s5071_s9 + $0xc8] sm:$0xff]  ;;  %v4201_v10 = vcombine.low %v294_v60, %v298_v61 }
  0xdf   : > { %v593_v13 = vld [vmem:[%s5071_s9 + $0xa60] sm:$0xff]  ;;  %3484 = vmatpush2.bf16.msra.mxu0 %v4503_v16  ;;  %v290_v7 = vld [vmem:[%s5071_s9 + $0xe8] sm:$0xff] }
  0xe0   : > { %v717_v14 = vld [vmem:[%s5071_s9 + $0xe40] sm:$0xff]  ;;  %v4496_v18 = vcombine.high %v589_v12, %v593_v13  ;;  %3524 = vmatprep.subr.bf16.mxu1 %v4632_v11  ;;  %v4495_v25 = vcombine.low %v589_v12, %v593_v13  ;;  %v418_v9 = vld [vmem:[%s5071_s9 + $0x4e8] sm:$0xff]  ;;  %v4329_v11 = vcombine.low %v422_v62, %v426_v63  ;;  %v4194_v12 = vcombine.high %v286_v6, %v290_v7 }
  0xe1   : > { %v721_v15 = vld [vmem:[%s5071_s9 + $0xe60] sm:$0xff]  ;;  %3525 = vmatpush2.bf16.msra.mxu1 %v4631_v17  ;;  %v4322_v13 = vcombine.high %v414_v8, %v418_v9  ;;  %v406_v16 = vld [vmem:[%s5071_s9 + $0x488] sm:$0xff] }
  0xe2   : > { %v4624_v19 = vcombine.high %v717_v14, %v721_v15  ;;  %v581_v20 = vld [vmem:[%s5071_s9 + $0xa00] sm:$0xff]  ;;  %3485 = vmatprep.subr.bf16.mxu0 %v4496_v18  ;;  %v4623_v26 = vcombine.low %v717_v14, %v721_v15  ;;  %v278_v14 = vld [vmem:[%s5071_s9 + $0x88] sm:$0xff]  ;;  %v4193_v18 = vcombine.low %v286_v6, %v290_v7 }
  0xe3   : > { %v585_v21 = vld [vmem:[%s5071_s9 + $0xa20] sm:$0xff]  ;;  %3486 = vmatpush2.bf16.msra.mxu0 %v4495_v25  ;;  %v282_v15 = vld [vmem:[%s5071_s9 + $0xa8] sm:$0xff] }
  0xe4   : > { %v709_v22 = vld [vmem:[%s5071_s9 + $0xe00] sm:$0xff]  ;;  %v4488_v27 = vcombine.high %v581_v20, %v585_v21  ;;  %3526 = vmatprep.subr.bf16.mxu1 %v4624_v19  ;;  %v4487_v34 = vcombine.low %v581_v20, %v585_v21  ;;  %v410_v17 = vld [vmem:[%s5071_s9 + $0x4a8] sm:$0xff]  ;;  %v4321_v19 = vcombine.low %v414_v8, %v418_v9  ;;  %v4186_v20 = vcombine.high %v278_v14, %v282_v15 }
  0xe5   : > { %v713_v23 = vld [vmem:[%s5071_s9 + $0xe20] sm:$0xff]  ;;  %3527 = vmatpush2.bf16.msra.mxu1 %v4623_v26  ;;  %v4314_v21 = vcombine.high %v406_v16, %v410_v17  ;;  %v398_v25 = vld [vmem:[%s5071_s9 + $0x448] sm:$0xff] }
  0xe6   : > { %v4616_v29 = vcombine.high %v709_v22, %v713_v23  ;;  %3487 = vmatprep.subr.bf16.mxu0 %v4488_v27  ;;  %v4615_v37 = vcombine.low %v709_v22, %v713_v23  ;;  %v270_v22 = vld [vmem:[%s5071_s9 + $0x48] sm:$0xff]  ;;  %v4185_v27 = vcombine.low %v278_v14, %v282_v15 }
  0xe7   : > { %3488 = vmatpush2.bf16.msra.mxu0 %v4487_v34  ;;  %v274_v23 = vld [vmem:[%s5071_s9 + $0x68] sm:$0xff] }
  0xe8   : > { %3528 = vmatprep.subr.bf16.mxu1 %v4616_v29  ;;  %3539 = vmatprep.subr.bf16.mxu0 %v4226_v40  ;;  %v402_v26 = vld [vmem:[%s5071_s9 + $0x468] sm:$0xff]  ;;  %v4313_v29 = vcombine.low %v406_v16, %v410_v17  ;;  %v4178_v30 = vcombine.high %v270_v22, %v274_v23 }
  0xe9   : > { %3529 = vmatpush2.bf16.msra.mxu1 %v4615_v37  ;;  %v4306_v31 = vcombine.high %v398_v25, %v402_v26  ;;  %v262_v32 = vld [vmem:[%s5071_s9 + $0x8] sm:$0xff]  ;;  %v4177_v37 = vcombine.low %v270_v22, %v274_v23  ;;  %v4305_v38 = vcombine.low %v398_v25, %v402_v26 }
  0xea   : > { %3580 = vmatprep.subr.bf16.mxu1 %v4354_v41  ;;  %3490 = vmatmul.mubr.bf16.vlgmr.msra.gmra.mxu0 %v5234_v44  ;;  %v266_v33 = vld [vmem:[%s5071_s9 + $0x28] sm:$0xff] }
  0xeb   : > { %3540 = vmatpush1.bf16.msra.mxu0 %v4225_v48  ;;  %3571 = vmatprep.mubr.bf16.mxu0 %v5112_v2  ;;  %v390_v34 = vld [vmem:[%s5071_s9 + $0x408] sm:$0xff]  ;;  %v4170_v40 = vcombine.high %v262_v32, %v266_v33  ;;  %v4169_v48 = vcombine.low %v262_v32, %v266_v33 }
  0xec   : > { %3531 = vmatmul.mubr.bf16.vlgmr.msra.gmra.mxu1 %v5238_v47  ;;  %3541 = vmatprep.subr.bf16.mxu0 %v4218_v50  ;;  %v394_v35 = vld [vmem:[%s5071_s9 + $0x428] sm:$0xff] }
  0xed   : > { %3581 = vmatpush1.bf16.msra.mxu1 %v4353_v49  ;;  %3612 = vmatprep.mubr.bf16.mxu1 %v5114_v3  ;;  %v4298_v41 = vcombine.high %v390_v34, %v394_v35  ;;  %v382_v42 = vld [vmem:[%s5071_s9 + $0x3c8] sm:$0xff]  ;;  %v4297_v49 = vcombine.low %v390_v34, %v394_v35 }
  0xee   : > { %3582 = vmatprep.subr.bf16.mxu1 %v4346_v51  ;;  %v386_v43 = vld [vmem:[%s5071_s9 + $0x3e8] sm:$0xff] }
  0xef   : > { %3542 = vmatpush1.bf16.msra.mxu0 %v4217_v56  ;;  %v510_v45 = vld [vmem:[%s5071_s9 + $0x7c8] sm:$0xff]  ;;  %v4290_v50 = vcombine.high %v382_v42, %v386_v43  ;;  %v4289_v56 = vcombine.low %v382_v42, %v386_v43 }
  0xf0   : > { %3543 = vmatprep.subr.bf16.mxu0 %v4210_v58  ;;  %v514_v46 = vld [vmem:[%s5071_s9 + $0x7e8] sm:$0xff] }
  0xf1   : > { %3583 = vmatpush1.bf16.msra.mxu1 %v4345_v57  ;;  %v4418_v51 = vcombine.high %v510_v45, %v514_v46  ;;  %v374_v52 = vld [vmem:[%s5071_s9 + $0x388] sm:$0xff]  ;;  %v4417_v57 = vcombine.low %v510_v45, %v514_v46 }
  0xf2   : > { %3584 = vmatprep.subr.bf16.mxu1 %v4338_v59  ;;  %v378_v53 = vld [vmem:[%s5071_s9 + $0x3a8] sm:$0xff] }
  0xf3   : > { %3544 = vmatpush1.bf16.msra.mxu0 %v4209_v0  ;;  %v502_v54 = vld [vmem:[%s5071_s9 + $0x788] sm:$0xff]  ;;  %v4282_v58 = vcombine.high %v374_v52, %v378_v53  ;;  %v4281_v0 = vcombine.low %v374_v52, %v378_v53 }
  0xf4   : > { %3545 = vmatprep.subr.bf16.mxu0 %v4202_v4  ;;  %v506_v55 = vld [vmem:[%s5071_s9 + $0x7a8] sm:$0xff] }
  0xf5   : > { %3585 = vmatpush1.bf16.msra.mxu1 %v4337_v1  ;;  %v4410_v59 = vcombine.high %v502_v54, %v506_v55  ;;  %v366_v60 = vld [vmem:[%s5071_s9 + $0x348] sm:$0xff]  ;;  %v4409_v1 = vcombine.low %v502_v54, %v506_v55 }
  0xf6   : > { %3586 = vmatprep.subr.bf16.mxu1 %v4330_v5  ;;  %v370_v61 = vld [vmem:[%s5071_s9 + $0x368] sm:$0xff] }
  0xf7   : > { %3546 = vmatpush1.bf16.msra.mxu0 %v4201_v10  ;;  %v494_v62 = vld [vmem:[%s5071_s9 + $0x748] sm:$0xff]  ;;  %v4274_v4 = vcombine.high %v366_v60, %v370_v61  ;;  %v4273_v10 = vcombine.low %v366_v60, %v370_v61 }
  0xf8   : > { %3547 = vmatprep.subr.bf16.mxu0 %v4194_v12  ;;  %v498_v63 = vld [vmem:[%s5071_s9 + $0x768] sm:$0xff] }
  0xf9   : > { %3587 = vmatpush1.bf16.msra.mxu1 %v4329_v11  ;;  %v4402_v5 = vcombine.high %v494_v62, %v498_v63  ;;  %v358_v6 = vld [vmem:[%s5071_s9 + $0x308] sm:$0xff]  ;;  %v4401_v11 = vcombine.low %v494_v62, %v498_v63 }
  0xfa   : > { %3588 = vmatprep.subr.bf16.mxu1 %v4322_v13  ;;  %v362_v7 = vld [vmem:[%s5071_s9 + $0x328] sm:$0xff] }
  0xfb   : > { %3548 = vmatpush1.bf16.msra.mxu0 %v4193_v18  ;;  %v486_v8 = vld [vmem:[%s5071_s9 + $0x708] sm:$0xff]  ;;  %v4266_v12 = vcombine.high %v358_v6, %v362_v7  ;;  %v4265_v18 = vcombine.low %v358_v6, %v362_v7 }
  0xfc   : > { %3549 = vmatprep.subr.bf16.mxu0 %v4186_v20  ;;  %v490_v9 = vld [vmem:[%s5071_s9 + $0x728] sm:$0xff] }
  0xfd   : > { %3589 = vmatpush1.bf16.msra.mxu1 %v4321_v19  ;;  %v4394_v13 = vcombine.high %v486_v8, %v490_v9  ;;  %v350_v14 = vld [vmem:[%s5071_s9 + $0x2c8] sm:$0xff]  ;;  %v4393_v19 = vcombine.low %v486_v8, %v490_v9 }
  0xfe   : > { %3590 = vmatprep.subr.bf16.mxu1 %v4314_v21  ;;  %v354_v15 = vld [vmem:[%s5071_s9 + $0x2e8] sm:$0xff] }
  0xff   : > { %3550 = vmatpush1.bf16.msra.mxu0 %v4185_v27  ;;  %v478_v16 = vld [vmem:[%s5071_s9 + $0x6c8] sm:$0xff]  ;;  %v4258_v20 = vcombine.high %v350_v14, %v354_v15  ;;  %v4257_v27 = vcombine.low %v350_v14, %v354_v15 }
 0x100   : > { %3551 = vmatprep.subr.bf16.mxu0 %v4178_v30  ;;  %v482_v17 = vld [vmem:[%s5071_s9 + $0x6e8] sm:$0xff] }
 0x101   : > { %3591 = vmatpush1.bf16.msra.mxu1 %v4313_v29  ;;  %v4386_v21 = vcombine.high %v478_v16, %v482_v17  ;;  %v342_v22 = vld [vmem:[%s5071_s9 + $0x288] sm:$0xff]  ;;  %v4385_v29 = vcombine.low %v478_v16, %v482_v17 }
 0x102   : > { %3592 = vmatprep.subr.bf16.mxu1 %v4306_v31  ;;  %v346_v23 = vld [vmem:[%s5071_s9 + $0x2a8] sm:$0xff] }
 0x103   : > { %3552 = vmatpush1.bf16.msra.mxu0 %v4177_v37  ;;  %v470_v25 = vld [vmem:[%s5071_s9 + $0x688] sm:$0xff]  ;;  %v4250_v30 = vcombine.high %v342_v22, %v346_v23  ;;  %v4249_v37 = vcombine.low %v342_v22, %v346_v23 }
 0x104   : > { %3553 = vmatprep.subr.bf16.mxu0 %v4170_v40  ;;  %v474_v26 = vld [vmem:[%s5071_s9 + $0x6a8] sm:$0xff] }
 0x105   : > { %3593 = vmatpush1.bf16.msra.mxu1 %v4305_v38  ;;  %v4378_v31 = vcombine.high %v470_v25, %v474_v26  ;;  %v334_v32 = vld [vmem:[%s5071_s9 + $0x248] sm:$0xff]  ;;  %v4377_v38 = vcombine.low %v470_v25, %v474_v26 }
 0x106   : > { %3594 = vmatprep.subr.bf16.mxu1 %v4298_v41  ;;  %v338_v33 = vld [vmem:[%s5071_s9 + $0x268] sm:$0xff] }
 0x107   : > { %3554 = vmatpush1.bf16.msra.mxu0 %v4169_v48  ;;  %v462_v34 = vld [vmem:[%s5071_s9 + $0x648] sm:$0xff]  ;;  %v4242_v40 = vcombine.high %v334_v32, %v338_v33  ;;  %v4241_v48 = vcombine.low %v334_v32, %v338_v33 }
 0x108   : > { %3555 = vmatprep.subr.bf16.mxu0 %v4290_v50  ;;  %v466_v35 = vld [vmem:[%s5071_s9 + $0x668] sm:$0xff] }
 0x109   : > { %3595 = vmatpush1.bf16.msra.mxu1 %v4297_v49  ;;  %v4370_v41 = vcombine.high %v462_v34, %v466_v35  ;;  %v326_v42 = vld [vmem:[%s5071_s9 + $0x208] sm:$0xff]  ;;  %v4369_v49 = vcombine.low %v462_v34, %v466_v35 }
 0x10a   : > { %3596 = vmatprep.subr.bf16.mxu1 %v4418_v51  ;;  %v330_v43 = vld [vmem:[%s5071_s9 + $0x228] sm:$0xff] }
 0x10b   : > { %3556 = vmatpush2.bf16.msra.mxu0 %v4289_v56  ;;  %v454_v45 = vld [vmem:[%s5071_s9 + $0x608] sm:$0xff]  ;;  %v4234_v50 = vcombine.high %v326_v42, %v330_v43  ;;  %v4233_v56 = vcombine.low %v326_v42, %v330_v43 }
 0x10c   : > { %3557 = vmatprep.subr.bf16.mxu0 %v4282_v58  ;;  %v458_v46 = vld [vmem:[%s5071_s9 + $0x628] sm:$0xff] }
 0x10d   : > { %3597 = vmatpush2.bf16.msra.mxu1 %v4417_v57  ;;  %v4362_v51 = vcombine.high %v454_v45, %v458_v46  ;;  %v574_v52 = vld [vmem:[%s5071_s9 + $0x9c8] sm:$0xff]  ;;  %v4361_v57 = vcombine.low %v454_v45, %v458_v46 }
 0x10e   : > { %3598 = vmatprep.subr.bf16.mxu1 %v4410_v59  ;;  %v578_v53 = vld [vmem:[%s5071_s9 + $0x9e8] sm:$0xff] }
 0x10f   : > { %3558 = vmatpush2.bf16.msra.mxu0 %v4281_v0  ;;  %v702_v54 = vld [vmem:[%s5071_s9 + $0xdc8] sm:$0xff]  ;;  %v4482_v58 = vcombine.high %v574_v52, %v578_v53  ;;  %v4481_v0 = vcombine.low %v574_v52, %v578_v53 }
 0x110   : > { %3559 = vmatprep.subr.bf16.mxu0 %v4274_v4  ;;  %v706_v55 = vld [vmem:[%s5071_s9 + $0xde8] sm:$0xff] }
 0x111   : > { %3599 = vmatpush2.bf16.msra.mxu1 %v4409_v1  ;;  %v4610_v59 = vcombine.high %v702_v54, %v706_v55  ;;  %v566_v60 = vld [vmem:[%s5071_s9 + $0x988] sm:$0xff]  ;;  %v4609_v1 = vcombine.low %v702_v54, %v706_v55 }
 0x112   : > { %3600 = vmatprep.subr.bf16.mxu1 %v4402_v5  ;;  %v570_v61 = vld [vmem:[%s5071_s9 + $0x9a8] sm:$0xff] }
 0x113   : > { %3560 = vmatpush2.bf16.msra.mxu0 %v4273_v10  ;;  %v694_v62 = vld [vmem:[%s5071_s9 + $0xd88] sm:$0xff]  ;;  %v4474_v4 = vcombine.high %v566_v60, %v570_v61  ;;  %v4473_v10 = vcombine.low %v566_v60, %v570_v61 }
 0x114   : > { %3561 = vmatprep.subr.bf16.mxu0 %v4266_v12  ;;  %v698_v63 = vld [vmem:[%s5071_s9 + $0xda8] sm:$0xff] }
 0x115   : > { %3601 = vmatpush2.bf16.msra.mxu1 %v4401_v11  ;;  %v4602_v5 = vcombine.high %v694_v62, %v698_v63  ;;  %v558_v6 = vld [vmem:[%s5071_s9 + $0x948] sm:$0xff]  ;;  %v4601_v11 = vcombine.low %v694_v62, %v698_v63 }
 0x116   : > { %3602 = vmatprep.subr.bf16.mxu1 %v4394_v13  ;;  %v562_v7 = vld [vmem:[%s5071_s9 + $0x968] sm:$0xff] }
 0x117   : > { %3562 = vmatpush2.bf16.msra.mxu0 %v4265_v18  ;;  %v686_v8 = vld [vmem:[%s5071_s9 + $0xd48] sm:$0xff]  ;;  %v4466_v12 = vcombine.high %v558_v6, %v562_v7  ;;  %v4465_v18 = vcombine.low %v558_v6, %v562_v7 }
 0x118   : > { %3563 = vmatprep.subr.bf16.mxu0 %v4258_v20  ;;  %v690_v9 = vld [vmem:[%s5071_s9 + $0xd68] sm:$0xff] }
 0x119   : > { %3603 = vmatpush2.bf16.msra.mxu1 %v4393_v19  ;;  %v4594_v13 = vcombine.high %v686_v8, %v690_v9  ;;  %v550_v14 = vld [vmem:[%s5071_s9 + $0x908] sm:$0xff]  ;;  %v4593_v19 = vcombine.low %v686_v8, %v690_v9 }
 0x11a   : > { %3604 = vmatprep.subr.bf16.mxu1 %v4386_v21  ;;  %v554_v15 = vld [vmem:[%s5071_s9 + $0x928] sm:$0xff] }
 0x11b   : > { %3564 = vmatpush2.bf16.msra.mxu0 %v4257_v27  ;;  %v678_v16 = vld [vmem:[%s5071_s9 + $0xd08] sm:$0xff]  ;;  %v4458_v20 = vcombine.high %v550_v14, %v554_v15  ;;  %v4457_v27 = vcombine.low %v550_v14, %v554_v15 }
 0x11c   : > { %3565 = vmatprep.subr.bf16.mxu0 %v4250_v30  ;;  %v682_v17 = vld [vmem:[%s5071_s9 + $0xd28] sm:$0xff] }
 0x11d   : > { %3605 = vmatpush2.bf16.msra.mxu1 %v4385_v29  ;;  %v4586_v21 = vcombine.high %v678_v16, %v682_v17  ;;  %v542_v22 = vld [vmem:[%s5071_s9 + $0x8c8] sm:$0xff]  ;;  %v4585_v29 = vcombine.low %v678_v16, %v682_v17 }
 0x11e   : > { %3606 = vmatprep.subr.bf16.mxu1 %v4378_v31  ;;  %v546_v23 = vld [vmem:[%s5071_s9 + $0x8e8] sm:$0xff] }
 0x11f   : > { %3566 = vmatpush2.bf16.msra.mxu0 %v4249_v37  ;;  %v670_v25 = vld [vmem:[%s5071_s9 + $0xcc8] sm:$0xff]  ;;  %v4450_v30 = vcombine.high %v542_v22, %v546_v23  ;;  %v4449_v37 = vcombine.low %v542_v22, %v546_v23 }
 0x120   : > { %3567 = vmatprep.subr.bf16.mxu0 %v4242_v40  ;;  %v674_v26 = vld [vmem:[%s5071_s9 + $0xce8] sm:$0xff] }
 0x121   : > { %3607 = vmatpush2.bf16.msra.mxu1 %v4377_v38  ;;  %v4578_v31 = vcombine.high %v670_v25, %v674_v26  ;;  %v534_v32 = vld [vmem:[%s5071_s9 + $0x888] sm:$0xff]  ;;  %v4577_v38 = vcombine.low %v670_v25, %v674_v26 }
 0x122   : > { %3608 = vmatprep.subr.bf16.mxu1 %v4370_v41  ;;  %v538_v33 = vld [vmem:[%s5071_s9 + $0x8a8] sm:$0xff] }
 0x123   : > { %3568 = vmatpush2.bf16.msra.mxu0 %v4241_v48  ;;  %v662_v34 = vld [vmem:[%s5071_s9 + $0xc88] sm:$0xff]  ;;  %v4442_v40 = vcombine.high %v534_v32, %v538_v33  ;;  %v4441_v48 = vcombine.low %v534_v32, %v538_v33 }
 0x124   : > { %3569 = vmatprep.subr.bf16.mxu0 %v4234_v50  ;;  %v666_v35 = vld [vmem:[%s5071_s9 + $0xca8] sm:$0xff] }
 0x125   : > { %3609 = vmatpush2.bf16.msra.mxu1 %v4369_v49  ;;  %v4570_v41 = vcombine.high %v662_v34, %v666_v35  ;;  %v526_v42 = vld [vmem:[%s5071_s9 + $0x848] sm:$0xff]  ;;  %v4569_v49 = vcombine.low %v662_v34, %v666_v35 }
 0x126   : > { %3610 = vmatprep.subr.bf16.mxu1 %v4362_v51  ;;  %v530_v43 = vld [vmem:[%s5071_s9 + $0x868] sm:$0xff] }
 0x127   : > { %3570 = vmatpush2.bf16.msra.mxu0 %v4233_v56  ;;  %v654_v45 = vld [vmem:[%s5071_s9 + $0xc48] sm:$0xff]  ;;  %v4434_v50 = vcombine.high %v526_v42, %v530_v43  ;;  %v4433_v56 = vcombine.low %v526_v42, %v530_v43 }
 0x128   : > { %3621 = vmatprep.subr.bf16.mxu0 %v4482_v58  ;;  %v658_v46 = vld [vmem:[%s5071_s9 + $0xc68] sm:$0xff] }
 0x129   : > { %3611 = vmatpush2.bf16.msra.mxu1 %v4361_v57  ;;  %v4562_v51 = vcombine.high %v654_v45, %v658_v46  ;;  %v518_v52 = vld [vmem:[%s5071_s9 + $0x808] sm:$0xff]  ;;  %v4561_v57 = vcombine.low %v654_v45, %v658_v46 }
 0x12a   : > { %3662 = vmatprep.subr.bf16.mxu1 %v4610_v59  ;;  %3572 = vmatmul.mubr.bf16.vlgmr.msra.gmra.mxu0 %v5158_v24  ;;  %v522_v53 = vld [vmem:[%s5071_s9 + $0x828] sm:$0xff] }
 0x12b   : > { %3622 = vmatpush1.bf16.msra.mxu0 %v4481_v0  ;;  %3653 = vmatprep.mubr.bf16.mxu0 %v5166_v36  ;;  %v646_v54 = vld [vmem:[%s5071_s9 + $0xc08] sm:$0xff]  ;;  %v4426_v58 = vcombine.high %v518_v52, %v522_v53  ;;  %v4425_v0 = vcombine.low %v518_v52, %v522_v53 }
 0x12c   : > { %3613 = vmatmul.mubr.bf16.vlgmr.msra.gmra.mxu1 %v5162_v28  ;;  %3623 = vmatprep.subr.bf16.mxu0 %v4474_v4  ;;  %v650_v55 = vld [vmem:[%s5071_s9 + $0xc28] sm:$0xff] }
 0x12d   : > { %3663 = vmatpush1.bf16.msra.mxu1 %v4609_v1  ;;  %3694 = vmatprep.mubr.bf16.mxu1 %v5171_v39  ;;  %v4554_v59 = vcombine.high %v646_v54, %v650_v55  ;;  %v638_v60 = vld [vmem:[%s5071_s9 + $0xbc8] sm:$0xff]  ;;  %v4553_v1 = vcombine.low %v646_v54, %v650_v55 }
 0x12e   : > { %3664 = vmatprep.subr.bf16.mxu1 %v4602_v5  ;;  %v642_v61 = vld [vmem:[%s5071_s9 + $0xbe8] sm:$0xff] }
 0x12f   : > { %3624 = vmatpush1.bf16.msra.mxu0 %v4473_v10  ;;  %v766_v62 = vld [vmem:[%s5071_s9 + $0xfc8] sm:$0xff]  ;;  %v4546_v4 = vcombine.high %v638_v60, %v642_v61  ;;  %v4545_v10 = vcombine.low %v638_v60, %v642_v61 }
 0x130   : > { %3625 = vmatprep.subr.bf16.mxu0 %v4466_v12  ;;  %v770_v63 = vld [vmem:[%s5071_s9 + $0xfe8] sm:$0xff] }
 0x131   : > { %3665 = vmatpush1.bf16.msra.mxu1 %v4601_v11  ;;  %v4674_v5 = vcombine.high %v766_v62, %v770_v63  ;;  %v630_v6 = vld [vmem:[%s5071_s9 + $0xb88] sm:$0xff]  ;;  %v4673_v11 = vcombine.low %v766_v62, %v770_v63 }
 0x132   : > { %3666 = vmatprep.subr.bf16.mxu1 %v4594_v13  ;;  %v634_v7 = vld [vmem:[%s5071_s9 + $0xba8] sm:$0xff] }
 0x133   : > { %3626 = vmatpush1.bf16.msra.mxu0 %v4465_v18  ;;  %v758_v8 = vld [vmem:[%s5071_s9 + $0xf88] sm:$0xff]  ;;  %v4538_v12 = vcombine.high %v630_v6, %v634_v7  ;;  %v4537_v18 = vcombine.low %v630_v6, %v634_v7 }
 0x134   : > { %3627 = vmatprep.subr.bf16.mxu0 %v4458_v20  ;;  %v762_v9 = vld [vmem:[%s5071_s9 + $0xfa8] sm:$0xff] }
 0x135   : > { %3667 = vmatpush1.bf16.msra.mxu1 %v4593_v19  ;;  %v4666_v13 = vcombine.high %v758_v8, %v762_v9  ;;  %v622_v14 = vld [vmem:[%s5071_s9 + $0xb48] sm:$0xff]  ;;  %v4665_v19 = vcombine.low %v758_v8, %v762_v9  ;;  %v319_v8 = vld [vmem:[%s5071_s9 + $0x1d0] sm:$0xff] }
 0x136   : > { %3668 = vmatprep.subr.bf16.mxu1 %v4586_v21  ;;  %v626_v15 = vld [vmem:[%s5071_s9 + $0xb68] sm:$0xff]  ;;  %v323_v9 = vld [vmem:[%s5071_s9 + $0x1f0] sm:$0xff] }
 0x137   : > { %3628 = vmatpush1.bf16.msra.mxu0 %v4457_v27  ;;  %v750_v16 = vld [vmem:[%s5071_s9 + $0xf48] sm:$0xff]  ;;  %v4530_v20 = vcombine.high %v622_v14, %v626_v15  ;;  %v4529_v27 = vcombine.low %v622_v14, %v626_v15 }
 0x138   : > { %3629 = vmatprep.subr.bf16.mxu0 %v4450_v30  ;;  %v754_v17 = vld [vmem:[%s5071_s9 + $0xf68] sm:$0xff] }
 0x139   : > { %3669 = vmatpush1.bf16.msra.mxu1 %v4585_v29  ;;  %v4658_v21 = vcombine.high %v750_v16, %v754_v17  ;;  %v614_v22 = vld [vmem:[%s5071_s9 + $0xb08] sm:$0xff]  ;;  %v4657_v29 = vcombine.low %v750_v16, %v754_v17  ;;  %v4228_v16 = vcombine.high %v319_v8, %v323_v9 }
 0x13a   : > { %3670 = vmatprep.subr.bf16.mxu1 %v4578_v31  ;;  %v618_v23 = vld [vmem:[%s5071_s9 + $0xb28] sm:$0xff] }
 0x13b   : > { %3630 = vmatpush1.bf16.msra.mxu0 %v4449_v37  ;;  %v742_v25 = vld [vmem:[%s5071_s9 + $0xf08] sm:$0xff]  ;;  %v4522_v30 = vcombine.high %v614_v22, %v618_v23  ;;  %v4521_v37 = vcombine.low %v614_v22, %v618_v23  ;;  %v443_v22 = vld [vmem:[%s5071_s9 + $0x5b0] sm:$0xff] }
 0x13c   : > { %3631 = vmatprep.subr.bf16.mxu0 %v4442_v40  ;;  %v746_v26 = vld [vmem:[%s5071_s9 + $0xf28] sm:$0xff] }
 0x13d   : > { %3671 = vmatpush1.bf16.msra.mxu1 %v4577_v38  ;;  %v4650_v31 = vcombine.high %v742_v25, %v746_v26  ;;  %v606_v32 = vld [vmem:[%s5071_s9 + $0xac8] sm:$0xff]  ;;  %v4649_v38 = vcombine.low %v742_v25, %v746_v26  ;;  %v4227_v25 = vcombine.low %v319_v8, %v323_v9 }
 0x13e   : > { %3672 = vmatprep.subr.bf16.mxu1 %v4570_v41  ;;  %v610_v33 = vld [vmem:[%s5071_s9 + $0xae8] sm:$0xff] }
 0x13f   : > { %3632 = vmatpush1.bf16.msra.mxu0 %v4441_v48  ;;  %v734_v34 = vld [vmem:[%s5071_s9 + $0xec8] sm:$0xff]  ;;  %v4514_v40 = vcombine.high %v606_v32, %v610_v33  ;;  %v4513_v48 = vcombine.low %v606_v32, %v610_v33  ;;  %v307_v32 = vld [vmem:[%s5071_s9 + $0x170] sm:$0xff] }
 0x140   : > { %3633 = vmatprep.subr.bf16.mxu0 %v4434_v50  ;;  %v738_v35 = vld [vmem:[%s5071_s9 + $0xee8] sm:$0xff] }
 0x141   : > { %3673 = vmatpush1.bf16.msra.mxu1 %v4569_v49  ;;  %v4642_v41 = vcombine.high %v734_v34, %v738_v35  ;;  %v598_v42 = vld [vmem:[%s5071_s9 + $0xa88] sm:$0xff]  ;;  %v4641_v49 = vcombine.low %v734_v34, %v738_v35  ;;  %v431_v34 = vld [vmem:[%s5071_s9 + $0x550] sm:$0xff] }
 0x142   : > { %3674 = vmatprep.subr.bf16.mxu1 %v4562_v51  ;;  %v602_v43 = vld [vmem:[%s5071_s9 + $0xaa8] sm:$0xff]  ;;  %v435_v35 = vld [vmem:[%s5071_s9 + $0x570] sm:$0xff] }
 0x143   : > { %3634 = vmatpush1.bf16.msra.mxu0 %v4433_v56  ;;  %v726_v45 = vld [vmem:[%s5071_s9 + $0xe88] sm:$0xff]  ;;  %v4506_v50 = vcombine.high %v598_v42, %v602_v43  ;;  %v4505_v56 = vcombine.low %v598_v42, %v602_v43 }
 0x144   : > { %3635 = vmatprep.subr.bf16.mxu0 %v4426_v58  ;;  %v730_v46 = vld [vmem:[%s5071_s9 + $0xea8] sm:$0xff] }
 0x145   : > { %3675 = vmatpush1.bf16.msra.mxu1 %v4561_v57  ;;  %v4634_v51 = vcombine.high %v726_v45, %v730_v46  ;;  %v590_v52 = vld [vmem:[%s5071_s9 + $0xa48] sm:$0xff]  ;;  %v775_v57 = vlaneseq  ;;  %v4633_v58 = vcombine.low %v726_v45, %v730_v46 }
 0x146   : > { %3676 = vmatprep.subr.bf16.mxu1 %v4554_v59  ;;  %v594_v53 = vld [vmem:[%s5071_s9 + $0xa68] sm:$0xff] }
 0x147   : > { %3636 = vmatpush1.bf16.msra.mxu0 %v4425_v0  ;;  %v718_v54 = vld [vmem:[%s5071_s9 + $0xe48] sm:$0xff]  ;;  %v4498_v59 = vcombine.high %v590_v52, %v594_v53 }
 0x148   : > { %3637 = vmatprep.subr.bf16.mxu0 %v4546_v4  ;;  %v722_v55 = vld [vmem:[%s5071_s9 + $0xe68] sm:$0xff]  ;;  %v5368_v4 = vshrl.u32 %v775_v57, 7 }
 0x149   : > { %3677 = vmatpush1.bf16.msra.mxu1 %v4553_v1  ;;  %v4626_v60 = vcombine.high %v718_v54, %v722_v55  ;;  %v582_v61 = vld [vmem:[%s5071_s9 + $0xa08] sm:$0xff]  ;;  %v4497_v1 = vcombine.low %v590_v52, %v594_v53  ;;  %v423_v53 = vld [vmem:[%s5071_s9 + $0x510] sm:$0xff] }
 0x14a   : > { %3678 = vmatprep.subr.bf16.mxu1 %v4674_v5  ;;  %v586_v62 = vld [vmem:[%s5071_s9 + $0xa28] sm:$0xff]  ;;  %v4625_v5 = vcombine.low %v718_v54, %v722_v55  ;;  %v427_v54 = vld [vmem:[%s5071_s9 + $0x530] sm:$0xff] }
 0x14b   : > { %3638 = vmatpush2.bf16.msra.mxu0 %v4545_v10  ;;  %v710_v63 = vld [vmem:[%s5071_s9 + $0xe08] sm:$0xff]  ;;  %v4490_v6 = vcombine.high %v582_v61, %v586_v62  ;;  %v447_v10 = vld [vmem:[%s5071_s9 + $0x5d0] sm:$0xff] }
 0x14c   : > { %3639 = vmatprep.subr.bf16.mxu0 %v4538_v12  ;;  %v714_v0 = vld [vmem:[%s5071_s9 + $0xe28] sm:$0xff]  ;;  %v4489_v12 = vcombine.low %v582_v61, %v586_v62  ;;  %v4332_v62 = vcombine.high %v423_v53, %v427_v54 }
 0x14d   : > { %3679 = vmatpush2.bf16.msra.mxu1 %v4673_v11  ;;  %v4618_v7 = vcombine.high %v710_v63, %v714_v0  ;;  %v451_v11 = vld [vmem:[%s5071_s9 + $0x5f0] sm:$0xff]  ;;  %v4617_v14 = vcombine.low %v710_v63, %v714_v0  ;;  %v5377_v15 = vld [vmem:[%s202_s25] sm:$0xff] }
 0x14e   : > { %3680 = vmatprep.subr.bf16.mxu1 %v4666_v13  ;;  %v777_v13 = vsub.s32 0, %v5368_v4  ;;  %v4356_v17 = vcombine.high %v447_v10, %v451_v11  ;;  %v4355_v26 = vcombine.low %v447_v10, %v451_v11  ;;  %v287_v63 = vld [vmem:[%s5071_s9 + $0xd0] sm:$0xff] }
 0x14f   : > { %3640 = vmatpush2.bf16.msra.mxu0 %v4537_v18  ;;  %v781_v18 = vsub.s32 1, %v5368_v4  ;;  %v291_v0 = vld [vmem:[%s5071_s9 + $0xf0] sm:$0xff] }
 0x150   : > { %3641 = vmatprep.subr.bf16.mxu0 %v4530_v20  ;;  %v315_v20 = vld [vmem:[%s5071_s9 + $0x1b0] sm:$0xff]  ;;  %v778_v23 = vrot.slane %v5377_v15, %v777_v13  ;;  %v4196_v8 = vcombine.high %v287_v63, %v291_v0 }
 0x151   : > { %3681 = vmatpush2.bf16.msra.mxu1 %v4665_v19  ;;  %v311_v19 = vld [vmem:[%s5071_s9 + $0x190] sm:$0xff] }
 0x152   : > { %3682 = vmatprep.subr.bf16.mxu1 %v4658_v21  ;;  %v439_v21 = vld [vmem:[%s5071_s9 + $0x590] sm:$0xff] }
 0x153   : > { %3642 = vmatpush2.bf16.msra.mxu0 %v4529_v27  ;;  %v4220_v27 = vcombine.high %v311_v19, %v315_v20  ;;  %v4347_v42 = vcombine.low %v439_v21, %v443_v22  ;;  %v279_v10 = vld [vmem:[%s5071_s9 + $0x90] sm:$0xff] }
 0x154   : > { %3643 = vmatprep.subr.bf16.mxu0 %v4522_v30  ;;  %v4348_v30 = vcombine.high %v439_v21, %v443_v22  ;;  %v283_v11 = vld [vmem:[%s5071_s9 + $0xb0] sm:$0xff] }
 0x155   : > { %3683 = vmatpush2.bf16.msra.mxu1 %v4657_v29  ;;  %v782_v29 = vrot.slane %v5377_v15, %v781_v18  ;;  %v411_v13 = vld [vmem:[%s5071_s9 + $0x4b0] sm:$0xff] }
 0x156   : > { %3684 = vmatprep.subr.bf16.mxu1 %v4650_v31  ;;  %v303_v31 = vld [vmem:[%s5071_s9 + $0x150] sm:$0xff] }
 0x157   : > { %3644 = vmatpush2.bf16.msra.mxu0 %v4521_v37  ;;  %v4212_v43 = vcombine.high %v303_v31, %v307_v32  ;;  %v4211_v57 = vcombine.low %v303_v31, %v307_v32  ;;  %v399_v21 = vld [vmem:[%s5071_s9 + $0x450] sm:$0xff] }
 0x158   : > { %3645 = vmatprep.subr.bf16.mxu0 %v4514_v40  ;;  %v4219_v40 = vcombine.low %v311_v19, %v315_v20  ;;  %v271_v19 = vld [vmem:[%s5071_s9 + $0x50] sm:$0xff] }
 0x159   : > { %3685 = vmatpush2.bf16.msra.mxu1 %v4649_v38  ;;  %v275_v20 = vld [vmem:[%s5071_s9 + $0x70] sm:$0xff] }
 0x15a   : > { %3686 = vmatprep.subr.bf16.mxu1 %v4642_v41  ;;  %v403_v22 = vld [vmem:[%s5071_s9 + $0x470] sm:$0xff] }
 0x15b   : > { %3646 = vmatpush2.bf16.msra.mxu0 %v4513_v48  ;;  %v391_v31 = vld [vmem:[%s5071_s9 + $0x410] sm:$0xff] }
 0x15c   : > { %3647 = vmatprep.subr.bf16.mxu0 %v4506_v50  ;;  %v295_v50 = vld [vmem:[%s5071_s9 + $0x110] sm:$0xff] }
 0x15d   : > { %3687 = vmatpush2.bf16.msra.mxu1 %v4641_v49  ;;  %v4340_v49 = vcombine.high %v431_v34, %v435_v35  ;;  %v395_v32 = vld [vmem:[%s5071_s9 + $0x430] sm:$0xff] }
 0x15e   : > { %3688 = vmatprep.subr.bf16.mxu1 %v4634_v51  ;;  %v299_v51 = vld [vmem:[%s5071_s9 + $0x130] sm:$0xff] }
 0x15f   : > { %3648 = vmatpush2.bf16.msra.mxu0 %v4505_v56 }
 0x160   : > { %3649 = vmatprep.subr.bf16.mxu0 %v4498_v59  ;;  %v4339_v59 = vcombine.low %v431_v34, %v435_v35  ;;  %v4307_v34 = vcombine.low %v399_v21, %v403_v22 }
 0x161   : > { %3689 = vmatpush2.bf16.msra.mxu1 %v4633_v58 }
 0x162   : > { %3690 = vmatprep.subr.bf16.mxu1 %v4626_v60  ;;  %v4204_v60 = vcombine.high %v295_v50, %v299_v51 }
 0x163   : > { %3650 = vmatpush2.bf16.msra.mxu0 %v4497_v1  ;;  %v415_v1 = vld [vmem:[%s5071_s9 + $0x4d0] sm:$0xff] }
 0x164   : > { %3651 = vmatprep.subr.bf16.mxu0 %v4490_v6  ;;  %v4203_v6 = vcombine.low %v295_v50, %v299_v51  ;;  %v375_v50 = vld [vmem:[%s5071_s9 + $0x390] sm:$0xff] }
 0x165   : > { %3691 = vmatpush2.bf16.msra.mxu1 %v4625_v5  ;;  %v419_v5 = vld [vmem:[%s5071_s9 + $0x4f0] sm:$0xff] }
 0x166   : > { %3692 = vmatprep.subr.bf16.mxu1 %v4618_v7  ;;  %v4331_v7 = vcombine.low %v423_v53, %v427_v54  ;;  %v4324_v9 = vcombine.high %v415_v1, %v419_v5  ;;  %v379_v51 = vld [vmem:[%s5071_s9 + $0x3b0] sm:$0xff] }
 0x167   : > { %3652 = vmatpush2.bf16.msra.mxu0 %v4489_v12  ;;  %v407_v12 = vld [vmem:[%s5071_s9 + $0x490] sm:$0xff] }
 0x168   : > { %3703 = vmatprep.subr.bf16.mxu0 %v4228_v16  ;;  %v4323_v16 = vcombine.low %v415_v1, %v419_v5  ;;  %v4316_v18 = vcombine.high %v407_v12, %v411_v13  ;;  %v507_v53 = vld [vmem:[%s5071_s9 + $0x7b0] sm:$0xff] }
 0x169   : > { %3693 = vmatpush2.bf16.msra.mxu1 %v4617_v14  ;;  %v3409_v33 = vpop.f32.mrf.mxu0  ;;  %v4195_v14 = vcombine.low %v287_v63, %v291_v0  ;;  %v4283_v63 = vcombine.low %v375_v50, %v379_v51 }
 0x16a   : > { %3744 = vmatprep.subr.bf16.mxu1 %v4356_v17  ;;  %3654 = vmatmul.mubr.bf16.vlgmr.msra.gmra.mxu0 %v5234_v44  ;;  %v3410_v37 = vadd.f32 %v3409_v33, %v778_v23  ;;  %v4188_v17 = vcombine.high %v279_v10, %v283_v11  ;;  %v4187_v23 = vcombine.low %v279_v10, %v283_v11 }
 0x16b   : > { %v3450_v38 = vpop.f32.mrf.mxu1  ;;  %3704 = vmatpush1.bf16.msra.mxu0 %v4227_v25  ;;  %v3411_v41 = vpop.f32.mrf.mxu0  ;;  %3735 = vmatprep.mubr.bf16.mxu0 %v5112_v2  ;;  %v4315_v25 = vcombine.low %v407_v12, %v411_v13  ;;  %v4179_v33 = vcombine.low %v271_v19, %v275_v20 }
 0x16c   : > { %3695 = vmatmul.mubr.bf16.vlgmr.msra.gmra.mxu1 %v5238_v47  ;;  %3705 = vmatprep.subr.bf16.mxu0 %v4220_v27  ;;  %v5392_v45 = vadd.f32 %v3450_v38, %v3410_v37  ;;  %v3412_v46 = vadd.f32 %v3411_v41, %v782_v29  ;;  %v4308_v27 = vcombine.high %v399_v21, %v403_v22  ;;  %v263_v29 = vld [vmem:[%s5071_s9 + $0x10] sm:$0xff] }
 0x16d   : > { %3745 = vmatpush1.bf16.msra.mxu1 %v4355_v26  ;;  %v3452_v48 = vpop.f32.mrf.mxu1  ;;  %v3413_v52 = vpop.f32.mrf.mxu0  ;;  %3776 = vmatprep.mubr.bf16.mxu1 %v5114_v3  ;;  %v4180_v26 = vcombine.high %v271_v19, %v275_v20  ;;  %v4300_v37 = vcombine.high %v391_v31, %v395_v32  ;;  %v383_v38 = vld [vmem:[%s5071_s9 + $0x3d0] sm:$0xff] }
 0x16e   : > { %3746 = vmatprep.subr.bf16.mxu1 %v4348_v30  ;;  %v5400_v55 = vadd.f32 %v3452_v48, %v3412_v46  ;;  %v267_v30 = vld [vmem:[%s5071_s9 + $0x30] sm:$0xff]  ;;  %v4299_v46 = vcombine.low %v391_v31, %v395_v32 }
 0x16f   : > { %v3454_v56 = vpop.f32.mrf.mxu1  ;;  %3706 = vmatpush1.bf16.msra.mxu0 %v4219_v40  ;;  %v3414_v58 = vpop.f32.mrf.mxu0  ;;  %v4172_v35 = vcombine.high %v263_v29, %v267_v30  ;;  %v387_v40 = vld [vmem:[%s5071_s9 + $0x3f0] sm:$0xff] }
 0x170   : > { %3707 = vmatprep.subr.bf16.mxu0 %v4212_v43  ;;  %v511_v41 = vld [vmem:[%s5071_s9 + $0x7d0] sm:$0xff]  ;;  %v4171_v43 = vcombine.low %v263_v29, %v267_v30  ;;  %v4292_v48 = vcombine.high %v383_v38, %v387_v40  ;;  %v4291_v54 = vcombine.low %v383_v38, %v387_v40 }
 0x171   : > { %3747 = vmatpush1.bf16.msra.mxu1 %v4347_v42  ;;  %v3455_v61 = vpop.f32.mrf.mxu1  ;;  %v515_v42 = vld [vmem:[%s5071_s9 + $0x7f0] sm:$0xff] }
 0x172   : > { %3748 = vmatprep.subr.bf16.mxu1 %v4340_v49  ;;  %v4420_v49 = vcombine.high %v511_v41, %v515_v42  ;;  %v503_v52 = vld [vmem:[%s5071_s9 + $0x790] sm:$0xff]  ;;  %v4419_v56 = vcombine.low %v511_v41, %v515_v42 }
 0x173   : > { %3708 = vmatpush1.bf16.msra.mxu0 %v4211_v57  ;;  %v4284_v57 = vcombine.high %v375_v50, %v379_v51  ;;  %v4412_v58 = vcombine.high %v503_v52, %v507_v53  ;;  %v495_v61 = vld [vmem:[%s5071_s9 + $0x750] sm:$0xff]  ;;  %v4411_v0 = vcombine.low %v503_v52, %v507_v53 }
 0x174   : > { %3709 = vmatprep.subr.bf16.mxu0 %v4204_v60  ;;  %v371_v60 = vld [vmem:[%s5071_s9 + $0x370] sm:$0xff] }
 0x175   : > { %3749 = vmatpush1.bf16.msra.mxu1 %v4339_v59  ;;  %v367_v59 = vld [vmem:[%s5071_s9 + $0x350] sm:$0xff] }
 0x176   : > { %3750 = vmatprep.subr.bf16.mxu1 %v4332_v62  ;;  %v499_v62 = vld [vmem:[%s5071_s9 + $0x770] sm:$0xff]  ;;  %v4276_v1 = vcombine.high %v367_v59, %v371_v60  ;;  %v4275_v10 = vcombine.low %v367_v59, %v371_v60 }
 0x177   : > { %3710 = vmatpush1.bf16.msra.mxu0 %v4203_v6  ;;  %v4404_v5 = vcombine.high %v495_v61, %v499_v62  ;;  %v359_v6 = vld [vmem:[%s5071_s9 + $0x310] sm:$0xff]  ;;  %v4403_v11 = vcombine.low %v495_v61, %v499_v62 }
 0x178   : > { %3711 = vmatprep.subr.bf16.mxu0 %v4196_v8  ;;  %v487_v8 = vld [vmem:[%s5071_s9 + $0x710] sm:$0xff] }
 0x179   : > { %3751 = vmatpush1.bf16.msra.mxu1 %v4331_v7  ;;  %v363_v7 = vld [vmem:[%s5071_s9 + $0x330] sm:$0xff] }
 0x17a   : > { %3752 = vmatprep.subr.bf16.mxu1 %v4324_v9  ;;  %v491_v9 = vld [vmem:[%s5071_s9 + $0x730] sm:$0xff]  ;;  %v4268_v12 = vcombine.high %v359_v6, %v363_v7  ;;  %v4267_v19 = vcombine.low %v359_v6, %v363_v7 }
 0x17b   : > { %3712 = vmatpush1.bf16.msra.mxu0 %v4195_v14  ;;  %v4396_v13 = vcombine.high %v487_v8, %v491_v9  ;;  %v351_v14 = vld [vmem:[%s5071_s9 + $0x2d0] sm:$0xff]  ;;  %v4395_v20 = vcombine.low %v487_v8, %v491_v9 }
 0x17c   : > { %3713 = vmatprep.subr.bf16.mxu0 %v4188_v17  ;;  %v479_v17 = vld [vmem:[%s5071_s9 + $0x6d0] sm:$0xff] }
 0x17d   : > { %3753 = vmatpush1.bf16.msra.mxu1 %v4323_v16  ;;  %v355_v16 = vld [vmem:[%s5071_s9 + $0x2f0] sm:$0xff] }
 0x17e   : > { %3754 = vmatprep.subr.bf16.mxu1 %v4316_v18  ;;  %v483_v18 = vld [vmem:[%s5071_s9 + $0x6f0] sm:$0xff]  ;;  %v4260_v21 = vcombine.high %v351_v14, %v355_v16  ;;  %v4259_v29 = vcombine.low %v351_v14, %v355_v16 }
 0x17f   : > { %3714 = vmatpush1.bf16.msra.mxu0 %v4187_v23  ;;  %v4388_v22 = vcombine.high %v479_v17, %v483_v18  ;;  %v343_v23 = vld [vmem:[%s5071_s9 + $0x290] sm:$0xff]  ;;  %v4387_v30 = vcombine.low %v479_v17, %v483_v18 }
 0x180   : > { %3715 = vmatprep.subr.bf16.mxu0 %v4180_v26  ;;  %v471_v26 = vld [vmem:[%s5071_s9 + $0x690] sm:$0xff] }
 0x181   : > { %3755 = vmatpush1.bf16.msra.mxu1 %v4315_v25  ;;  %v347_v25 = vld [vmem:[%s5071_s9 + $0x2b0] sm:$0xff] }
 0x182   : > { %3756 = vmatprep.subr.bf16.mxu1 %v4308_v27  ;;  %v475_v27 = vld [vmem:[%s5071_s9 + $0x6b0] sm:$0xff]  ;;  %v4252_v31 = vcombine.high %v343_v23, %v347_v25  ;;  %v4251_v38 = vcombine.low %v343_v23, %v347_v25 }
 0x183   : > { %3716 = vmatpush1.bf16.msra.mxu0 %v4179_v33  ;;  %v4380_v32 = vcombine.high %v471_v26, %v475_v27  ;;  %v335_v33 = vld [vmem:[%s5071_s9 + $0x250] sm:$0xff]  ;;  %v4379_v40 = vcombine.low %v471_v26, %v475_v27 }
 0x184   : > { %3717 = vmatprep.subr.bf16.mxu0 %v4172_v35  ;;  %v463_v35 = vld [vmem:[%s5071_s9 + $0x650] sm:$0xff] }
 0x185   : > { %3757 = vmatpush1.bf16.msra.mxu1 %v4307_v34  ;;  %v339_v34 = vld [vmem:[%s5071_s9 + $0x270] sm:$0xff] }
 0x186   : > { %3758 = vmatprep.subr.bf16.mxu1 %v4300_v37  ;;  %v467_v37 = vld [vmem:[%s5071_s9 + $0x670] sm:$0xff]  ;;  %v4244_v41 = vcombine.high %v335_v33, %v339_v34  ;;  %v4243_v50 = vcombine.low %v335_v33, %v339_v34 }
 0x187   : > { %3718 = vmatpush1.bf16.msra.mxu0 %v4171_v43  ;;  %v4372_v42 = vcombine.high %v463_v35, %v467_v37  ;;  %v327_v43 = vld [vmem:[%s5071_s9 + $0x210] sm:$0xff]  ;;  %v4371_v51 = vcombine.low %v463_v35, %v467_v37 }
 0x188   : > { %3719 = vmatprep.subr.bf16.mxu0 %v4292_v48  ;;  %v455_v48 = vld [vmem:[%s5071_s9 + $0x610] sm:$0xff] }
 0x189   : > { %3759 = vmatpush1.bf16.msra.mxu1 %v4299_v46  ;;  %v331_v46 = vld [vmem:[%s5071_s9 + $0x230] sm:$0xff] }
 0x18a   : > { %3760 = vmatprep.subr.bf16.mxu1 %v4420_v49  ;;  %v459_v49 = vld [vmem:[%s5071_s9 + $0x630] sm:$0xff]  ;;  %v4236_v52 = vcombine.high %v327_v43, %v331_v46  ;;  %v4235_v59 = vcombine.low %v327_v43, %v331_v46 }
 0x18b   : > { %3720 = vmatpush2.bf16.msra.mxu0 %v4291_v54  ;;  %v4364_v53 = vcombine.high %v455_v48, %v459_v49  ;;  %v575_v54 = vld [vmem:[%s5071_s9 + $0x9d0] sm:$0xff]  ;;  %v4363_v60 = vcombine.low %v455_v48, %v459_v49 }
 0x18c   : > { %3721 = vmatprep.subr.bf16.mxu0 %v4284_v57  ;;  %v703_v57 = vld [vmem:[%s5071_s9 + $0xdd0] sm:$0xff] }
 0x18d   : > { %3761 = vmatpush2.bf16.msra.mxu1 %v4419_v56  ;;  %v579_v56 = vld [vmem:[%s5071_s9 + $0x9f0] sm:$0xff] }
 0x18e   : > { %3762 = vmatprep.subr.bf16.mxu1 %v4412_v58  ;;  %v707_v58 = vld [vmem:[%s5071_s9 + $0xdf0] sm:$0xff]  ;;  %v4484_v61 = vcombine.high %v575_v54, %v579_v56  ;;  %v4483_v6 = vcombine.low %v575_v54, %v579_v56 }
 0x18f   : > { %3722 = vmatpush2.bf16.msra.mxu0 %v4283_v63  ;;  %v4612_v62 = vcombine.high %v703_v57, %v707_v58  ;;  %v567_v63 = vld [vmem:[%s5071_s9 + $0x990] sm:$0xff]  ;;  %v4611_v7 = vcombine.low %v703_v57, %v707_v58 }
 0x190   : > { %3723 = vmatprep.subr.bf16.mxu0 %v4276_v1  ;;  %v695_v1 = vld [vmem:[%s5071_s9 + $0xd90] sm:$0xff] }
 0x191   : > { %3763 = vmatpush2.bf16.msra.mxu1 %v4411_v0  ;;  %v571_v0 = vld [vmem:[%s5071_s9 + $0x9b0] sm:$0xff] }
 0x192   : > { %3764 = vmatprep.subr.bf16.mxu1 %v4404_v5  ;;  %v699_v5 = vld [vmem:[%s5071_s9 + $0xdb0] sm:$0xff]  ;;  %v4476_v8 = vcombine.high %v567_v63, %v571_v0  ;;  %v4475_v18 = vcombine.low %v567_v63, %v571_v0 }
 0x193   : > { %3724 = vmatpush2.bf16.msra.mxu0 %v4275_v10  ;;  %v4604_v9 = vcombine.high %v695_v1, %v699_v5  ;;  %v559_v10 = vld [vmem:[%s5071_s9 + $0x950] sm:$0xff] }
 0x194   : > { %3725 = vmatprep.subr.bf16.mxu0 %v4268_v12  ;;  %v691_v14 = vld [vmem:[%s5071_s9 + $0xd70] sm:$0xff] }
 0x195   : > { %3765 = vmatpush2.bf16.msra.mxu1 %v4403_v11  ;;  %v563_v11 = vld [vmem:[%s5071_s9 + $0x970] sm:$0xff] }
 0x196   : > { %3766 = vmatprep.subr.bf16.mxu1 %v4396_v13  ;;  %v687_v13 = vld [vmem:[%s5071_s9 + $0xd50] sm:$0xff] }
 0x197   : > { %3726 = vmatpush2.bf16.msra.mxu0 %v4267_v19  ;;  %v551_v26 = vld [vmem:[%s5071_s9 + $0x910] sm:$0xff]  ;;  %v4595_v35 = vcombine.low %v687_v13, %v691_v14 }
 0x198   : > { %3727 = vmatprep.subr.bf16.mxu0 %v4260_v21  ;;  %v4468_v21 = vcombine.high %v559_v10, %v563_v11  ;;  %v555_v27 = vld [vmem:[%s5071_s9 + $0x930] sm:$0xff] }
 0x199   : > { %3767 = vmatpush2.bf16.msra.mxu1 %v4395_v20  ;;  %v4603_v20 = vcombine.low %v695_v1, %v699_v5  ;;  %v4460_v37 = vcombine.high %v551_v26, %v555_v27  ;;  %v671_v43 = vld [vmem:[%s5071_s9 + $0xcd0] sm:$0xff]  ;;  %v4459_v48 = vcombine.low %v551_v26, %v555_v27 }
 0x19a   : > { %3768 = vmatprep.subr.bf16.mxu1 %v4388_v22  ;;  %v675_v46 = vld [vmem:[%s5071_s9 + $0xcf0] sm:$0xff] }
 0x19b   : > { %3728 = vmatpush2.bf16.msra.mxu0 %v4259_v29  ;;  %v663_v54 = vld [vmem:[%s5071_s9 + $0xc90] sm:$0xff]  ;;  %v4579_v58 = vcombine.low %v671_v43, %v675_v46 }
 0x19c   : > { %3729 = vmatprep.subr.bf16.mxu0 %v4252_v31  ;;  %v683_v31 = vld [vmem:[%s5071_s9 + $0xd30] sm:$0xff] }
 0x19d   : > { %3769 = vmatpush2.bf16.msra.mxu1 %v4387_v30  ;;  %v679_v30 = vld [vmem:[%s5071_s9 + $0xd10] sm:$0xff] }
 0x19e   : > { %3770 = vmatprep.subr.bf16.mxu1 %v4380_v32  ;;  %v4587_v49 = vcombine.low %v679_v30, %v683_v31  ;;  %v667_v56 = vld [vmem:[%s5071_s9 + $0xcb0] sm:$0xff] }
 0x19f   : > { %3730 = vmatpush2.bf16.msra.mxu0 %v4251_v38  ;;  %v655_v63 = vld [vmem:[%s5071_s9 + $0xc50] sm:$0xff]  ;;  %v4571_v5 = vcombine.low %v663_v54, %v667_v56 }
 0x1a0   : > { %3731 = vmatprep.subr.bf16.mxu0 %v4244_v41  ;;  %v543_v41 = vld [vmem:[%s5071_s9 + $0x8d0] sm:$0xff] }
 0x1a1   : > { %3771 = vmatpush2.bf16.msra.mxu1 %v4379_v40  ;;  %v4588_v40 = vcombine.high %v679_v30, %v683_v31  ;;  %v659_v0 = vld [vmem:[%s5071_s9 + $0xc70] sm:$0xff] }
 0x1a2   : > { %3772 = vmatprep.subr.bf16.mxu1 %v4372_v42  ;;  %v547_v42 = vld [vmem:[%s5071_s9 + $0x8f0] sm:$0xff] }
 0x1a3   : > { %3732 = vmatpush2.bf16.msra.mxu0 %v4243_v50  ;;  %v4452_v50 = vcombine.high %v543_v41, %v547_v42  ;;  %v4451_v57 = vcombine.low %v543_v41, %v547_v42  ;;  %v631_v26 = vld [vmem:[%s5071_s9 + $0xb90] sm:$0xff] }
 0x1a4   : > { %3733 = vmatprep.subr.bf16.mxu0 %v4236_v52  ;;  %v535_v52 = vld [vmem:[%s5071_s9 + $0x890] sm:$0xff] }
 0x1a5   : > { %3773 = vmatpush2.bf16.msra.mxu1 %v4371_v51  ;;  %v4580_v51 = vcombine.high %v671_v43, %v675_v46  ;;  %v635_v27 = vld [vmem:[%s5071_s9 + $0xbb0] sm:$0xff] }
 0x1a6   : > { %3774 = vmatprep.subr.bf16.mxu1 %v4364_v53  ;;  %v539_v53 = vld [vmem:[%s5071_s9 + $0x8b0] sm:$0xff]  ;;  %v4539_v41 = vcombine.low %v631_v26, %v635_v27 }
 0x1a7   : > { %3734 = vmatpush2.bf16.msra.mxu0 %v4235_v59  ;;  %v4444_v59 = vcombine.high %v535_v52, %v539_v53  ;;  %v4443_v1 = vcombine.low %v535_v52, %v539_v53  ;;  %v763_v30 = vld [vmem:[%s5071_s9 + $0xfb0] sm:$0xff] }
 0x1a8   : > { %3785 = vmatprep.subr.bf16.mxu0 %v4484_v61  ;;  %v527_v61 = vld [vmem:[%s5071_s9 + $0x850] sm:$0xff] }
 0x1a9   : > { %3775 = vmatpush2.bf16.msra.mxu1 %v4363_v60  ;;  %v4572_v60 = vcombine.high %v663_v54, %v667_v56 }
 0x1aa   : > { %3826 = vmatprep.subr.bf16.mxu1 %v4612_v62  ;;  %v3491_v12 = vpop.f32.mrf.mxu0  ;;  %3736 = vmatmul.mubr.bf16.vlgmr.msra.gmra.mxu0 %v5158_v24  ;;  %v531_v62 = vld [vmem:[%s5071_s9 + $0x870] sm:$0xff] }
 0x1ab   : > { %v3492_v16 = vadd.f32 %v3491_v12, %v5392_v45  ;;  %3786 = vmatpush1.bf16.msra.mxu0 %v4483_v6  ;;  %v4596_v45 = vcombine.high %v687_v13, %v691_v14  ;;  %3817 = vmatprep.mubr.bf16.mxu0 %v5166_v36  ;;  %v4436_v6 = vcombine.high %v527_v61, %v531_v62 }
 0x1ac   : > { %v3532_v17 = vpop.f32.mrf.mxu1  ;;  %3777 = vmatmul.mubr.bf16.vlgmr.msra.gmra.mxu1 %v5162_v28  ;;  %v3493_v19 = vpop.f32.mrf.mxu0  ;;  %3787 = vmatprep.subr.bf16.mxu0 %v4476_v8  ;;  %v519_v8 = vld [vmem:[%s5071_s9 + $0x810] sm:$0xff]  ;;  %v4435_v12 = vcombine.low %v527_v61, %v531_v62  ;;  %v4563_v13 = vcombine.low %v655_v63, %v659_v0 }
 0x1ad   : > { %3827 = vmatpush1.bf16.msra.mxu1 %v4611_v7  ;;  %v5465_v22 = vadd.f32 %v3532_v17, %v3492_v16  ;;  %v3494_v23 = vadd.f32 %v3493_v19, %v5400_v55  ;;  %3858 = vmatprep.mubr.bf16.mxu1 %v5171_v39  ;;  %v4467_v55 = vcombine.low %v559_v10, %v563_v11  ;;  %v647_v10 = vld [vmem:[%s5071_s9 + $0xc10] sm:$0xff] }
 0x1ae   : > { %v3534_v25 = vpop.f32.mrf.mxu1  ;;  %3828 = vmatprep.subr.bf16.mxu1 %v4604_v9  ;;  %v3495_v29 = vpop.f32.mrf.mxu0  ;;  %v4564_v7 = vcombine.high %v655_v63, %v659_v0  ;;  %v523_v9 = vld [vmem:[%s5071_s9 + $0x830] sm:$0xff] }
 0x1af   : > { %v5474_v32 = vadd.f32 %v3534_v25, %v3494_v23  ;;  %3788 = vmatpush1.bf16.msra.mxu0 %v4475_v18  ;;  %v651_v11 = vld [vmem:[%s5071_s9 + $0xc30] sm:$0xff]  ;;  %v4428_v14 = vcombine.high %v519_v8, %v523_v9 }
 0x1b0   : > { %v3536_v33 = vpop.f32.mrf.mxu1  ;;  %v3496_v34 = vpop.f32.mrf.mxu0  ;;  %3789 = vmatprep.subr.bf16.mxu0 %v4468_v21  ;;  %v4556_v16 = vcombine.high %v647_v10, %v651_v11  ;;  %v639_v17 = vld [vmem:[%s5071_s9 + $0xbd0] sm:$0xff]  ;;  %v4427_v21 = vcombine.low %v519_v8, %v523_v9  ;;  %v4555_v23 = vcombine.low %v647_v10, %v651_v11 }
 0x1b1   : > { %3829 = vmatpush1.bf16.msra.mxu1 %v4603_v20  ;;  %v643_v18 = vld [vmem:[%s5071_s9 + $0xbf0] sm:$0xff] }
 0x1b2   : > { %v3537_v38 = vpop.f32.mrf.mxu1  ;;  %3830 = vmatprep.subr.bf16.mxu1 %v4596_v45  ;;  %v767_v19 = vld [vmem:[%s5071_s9 + $0xfd0] sm:$0xff]  ;;  %v4548_v25 = vcombine.high %v639_v17, %v643_v18  ;;  %v4547_v31 = vcombine.low %v639_v17, %v643_v18 }
 0x1b3   : > { %3790 = vmatpush1.bf16.msra.mxu0 %v4467_v55  ;;  %v771_v20 = vld [vmem:[%s5071_s9 + $0xff0] sm:$0xff]  ;;  %v4540_v55 = vcombine.high %v631_v26, %v635_v27 }
 0x1b4   : > { %3791 = vmatprep.subr.bf16.mxu0 %v4460_v37  ;;  %v4676_v45 = vcombine.high %v767_v19, %v771_v20  ;;  %v759_v29 = vld [vmem:[%s5071_s9 + $0xf90] sm:$0xff]  ;;  %v4675_v33 = vcombine.low %v767_v19, %v771_v20 }
 0x1b5   : > { %3831 = vmatpush1.bf16.msra.mxu1 %v4595_v35  ;;  %v4668_v34 = vcombine.high %v759_v29, %v763_v30  ;;  %v623_v35 = vld [vmem:[%s5071_s9 + $0xb50] sm:$0xff]  ;;  %v4667_v42 = vcombine.low %v759_v29, %v763_v30 }
 0x1b6   : > { %3832 = vmatprep.subr.bf16.mxu1 %v4588_v40  ;;  %v627_v37 = vld [vmem:[%s5071_s9 + $0xb70] sm:$0xff] }
 0x1b7   : > { %3792 = vmatpush1.bf16.msra.mxu0 %v4459_v48  ;;  %v751_v38 = vld [vmem:[%s5071_s9 + $0xf50] sm:$0xff]  ;;  %v4532_v43 = vcombine.high %v623_v35, %v627_v37  ;;  %v4531_v52 = vcombine.low %v623_v35, %v627_v37  ;;  %v785_v37 = vsub.s32 2, %v5368_v4 }
 0x1b8   : > { %3793 = vmatprep.subr.bf16.mxu0 %v4452_v50  ;;  %v755_v40 = vld [vmem:[%s5071_s9 + $0xf70] sm:$0xff] }
 0x1b9   : > { %3833 = vmatpush1.bf16.msra.mxu1 %v4587_v49  ;;  %v4660_v46 = vcombine.high %v751_v38, %v755_v40  ;;  %v615_v48 = vld [vmem:[%s5071_s9 + $0xb10] sm:$0xff]  ;;  %v4659_v53 = vcombine.low %v751_v38, %v755_v40 }
 0x1ba   : > { %3834 = vmatprep.subr.bf16.mxu1 %v4580_v51  ;;  %v619_v49 = vld [vmem:[%s5071_s9 + $0xb30] sm:$0xff] }
 0x1bb   : > { %3794 = vmatpush1.bf16.msra.mxu0 %v4451_v57  ;;  %v743_v50 = vld [vmem:[%s5071_s9 + $0xf10] sm:$0xff]  ;;  %v4524_v54 = vcombine.high %v615_v48, %v619_v49  ;;  %v4523_v61 = vcombine.low %v615_v48, %v619_v49  ;;  %v440_v48 = vld [vmem:[%s5071_s9 + $0x598] sm:$0xff] }
 0x1bc   : > { %3795 = vmatprep.subr.bf16.mxu0 %v4444_v59  ;;  %v747_v51 = vld [vmem:[%s5071_s9 + $0xf30] sm:$0xff]  ;;  %v444_v49 = vld [vmem:[%s5071_s9 + $0x5b8] sm:$0xff] }
 0x1bd   : > { %3835 = vmatpush1.bf16.msra.mxu1 %v4579_v58  ;;  %v4652_v56 = vcombine.high %v743_v50, %v747_v51  ;;  %v607_v57 = vld [vmem:[%s5071_s9 + $0xad0] sm:$0xff]  ;;  %v4651_v62 = vcombine.low %v743_v50, %v747_v51  ;;  %v786_v50 = vrot.slane %v5377_v15, %v785_v37 }
 0x1be   : > { %3836 = vmatprep.subr.bf16.mxu1 %v4572_v60  ;;  %v611_v58 = vld [vmem:[%s5071_s9 + $0xaf0] sm:$0xff] }
 0x1bf   : > { %3796 = vmatpush1.bf16.msra.mxu0 %v4443_v1  ;;  %v735_v59 = vld [vmem:[%s5071_s9 + $0xed0] sm:$0xff]  ;;  %v4516_v63 = vcombine.high %v607_v57, %v611_v58  ;;  %v4515_v8 = vcombine.low %v607_v57, %v611_v58  ;;  %v304_v57 = vld [vmem:[%s5071_s9 + $0x158] sm:$0xff] }
 0x1c0   : > { %3797 = vmatprep.subr.bf16.mxu0 %v4436_v6  ;;  %v739_v60 = vld [vmem:[%s5071_s9 + $0xef0] sm:$0xff]  ;;  %v308_v58 = vld [vmem:[%s5071_s9 + $0x178] sm:$0xff] }
 0x1c1   : > { %3837 = vmatpush1.bf16.msra.mxu1 %v4571_v5  ;;  %v4644_v0 = vcombine.high %v735_v59, %v739_v60  ;;  %v599_v1 = vld [vmem:[%s5071_s9 + $0xa90] sm:$0xff]  ;;  %v4643_v9 = vcombine.low %v735_v59, %v739_v60  ;;  %v432_v60 = vld [vmem:[%s5071_s9 + $0x558] sm:$0xff] }
 0x1c2   : > { %3838 = vmatprep.subr.bf16.mxu1 %v4564_v7  ;;  %v603_v5 = vld [vmem:[%s5071_s9 + $0xab0] sm:$0xff] }
 0x1c3   : > { %3798 = vmatpush1.bf16.msra.mxu0 %v4435_v12  ;;  %v727_v6 = vld [vmem:[%s5071_s9 + $0xe90] sm:$0xff]  ;;  %v4508_v10 = vcombine.high %v599_v1, %v603_v5  ;;  %v4507_v17 = vcombine.low %v599_v1, %v603_v5  ;;  %v4349_v1 = vcombine.low %v440_v48, %v444_v49  ;;  %v4214_v5 = vcombine.high %v304_v57, %v308_v58 }
 0x1c4   : > { %3799 = vmatprep.subr.bf16.mxu0 %v4428_v14  ;;  %v731_v7 = vld [vmem:[%s5071_s9 + $0xeb0] sm:$0xff] }
 0x1c5   : > { %3839 = vmatpush1.bf16.msra.mxu1 %v4563_v13  ;;  %v4636_v11 = vcombine.high %v727_v6, %v731_v7  ;;  %v591_v12 = vld [vmem:[%s5071_s9 + $0xa50] sm:$0xff]  ;;  %v4635_v18 = vcombine.low %v727_v6, %v731_v7 }
 0x1c6   : > { %3840 = vmatprep.subr.bf16.mxu1 %v4556_v16  ;;  %v595_v13 = vld [vmem:[%s5071_s9 + $0xa70] sm:$0xff] }
 0x1c7   : > { %3800 = vmatpush1.bf16.msra.mxu0 %v4427_v21  ;;  %v719_v14 = vld [vmem:[%s5071_s9 + $0xe50] sm:$0xff]  ;;  %v4500_v19 = vcombine.high %v591_v12, %v595_v13  ;;  %v4499_v26 = vcombine.low %v591_v12, %v595_v13  ;;  %v424_v13 = vld [vmem:[%s5071_s9 + $0x518] sm:$0xff] }
 0x1c8   : > { %3801 = vmatprep.subr.bf16.mxu0 %v4548_v25  ;;  %v723_v16 = vld [vmem:[%s5071_s9 + $0xe70] sm:$0xff] }
 0x1c9   : > { %3841 = vmatpush1.bf16.msra.mxu1 %v4555_v23  ;;  %v4628_v20 = vcombine.high %v719_v14, %v723_v16  ;;  %v583_v21 = vld [vmem:[%s5071_s9 + $0xa10] sm:$0xff]  ;;  %v4627_v27 = vcombine.low %v719_v14, %v723_v16  ;;  %v428_v14 = vld [vmem:[%s5071_s9 + $0x538] sm:$0xff] }
 0x1ca   : > { %3842 = vmatprep.subr.bf16.mxu1 %v4676_v45  ;;  %v587_v23 = vld [vmem:[%s5071_s9 + $0xa30] sm:$0xff] }
 0x1cb   : > { %3802 = vmatpush2.bf16.msra.mxu0 %v4547_v31  ;;  %v711_v25 = vld [vmem:[%s5071_s9 + $0xe10] sm:$0xff]  ;;  %v4492_v29 = vcombine.high %v583_v21, %v587_v23  ;;  %v320_v31 = vld [vmem:[%s5071_s9 + $0x1d8] sm:$0xff]  ;;  %v4491_v35 = vcombine.low %v583_v21, %v587_v23  ;;  %v4334_v23 = vcombine.high %v424_v13, %v428_v14 }
 0x1cc   : > { %3803 = vmatprep.subr.bf16.mxu0 %v4540_v55  ;;  %v715_v45 = vld [vmem:[%s5071_s9 + $0xe30] sm:$0xff]  ;;  %v448_v55 = vld [vmem:[%s5071_s9 + $0x5d8] sm:$0xff] }
 0x1cd   : > { %3843 = vmatpush2.bf16.msra.mxu1 %v4675_v33  ;;  %v4620_v30 = vcombine.high %v711_v25, %v715_v45  ;;  %v324_v33 = vld [vmem:[%s5071_s9 + $0x1f8] sm:$0xff]  ;;  %v4619_v38 = vcombine.low %v711_v25, %v715_v45 }
 0x1ce   : > { %3844 = vmatprep.subr.bf16.mxu1 %v4668_v34  ;;  %v452_v34 = vld [vmem:[%s5071_s9 + $0x5f8] sm:$0xff]  ;;  %v4230_v40 = vcombine.high %v320_v31, %v324_v33  ;;  %v4229_v51 = vcombine.low %v320_v31, %v324_v33 }
 0x1cf   : > { %3804 = vmatpush2.bf16.msra.mxu0 %v4539_v41  ;;  %v4358_v41 = vcombine.high %v448_v55, %v452_v34  ;;  %v288_v25 = vld [vmem:[%s5071_s9 + $0xd8] sm:$0xff] }
 0x1d0   : > { %3805 = vmatprep.subr.bf16.mxu0 %v4532_v43  ;;  %v312_v43 = vld [vmem:[%s5071_s9 + $0x198] sm:$0xff] }
 0x1d1   : > { %3845 = vmatpush2.bf16.msra.mxu1 %v4667_v42  ;;  %v789_v42 = vsub.s32 3, %v5368_v4  ;;  %v416_v45 = vld [vmem:[%s5071_s9 + $0x4d8] sm:$0xff] }
 0x1d2   : > { %3846 = vmatprep.subr.bf16.mxu1 %v4660_v46  ;;  %v316_v46 = vld [vmem:[%s5071_s9 + $0x1b8] sm:$0xff] }
 0x1d3   : > { %3806 = vmatpush2.bf16.msra.mxu0 %v4531_v52  ;;  %v4357_v52 = vcombine.low %v448_v55, %v452_v34  ;;  %v280_v33 = vld [vmem:[%s5071_s9 + $0x98] sm:$0xff] }
 0x1d4   : > { %3807 = vmatprep.subr.bf16.mxu0 %v4524_v54  ;;  %v790_v54 = vrot.slane %v5377_v15, %v789_v42  ;;  %v284_v55 = vld [vmem:[%s5071_s9 + $0xb8] sm:$0xff] }
 0x1d5   : > { %3847 = vmatpush2.bf16.msra.mxu1 %v4659_v53  ;;  %v4222_v53 = vcombine.high %v312_v43, %v316_v46  ;;  %v408_v34 = vld [vmem:[%s5071_s9 + $0x498] sm:$0xff] }
 0x1d6   : > { %3848 = vmatprep.subr.bf16.mxu1 %v4652_v56  ;;  %v4350_v56 = vcombine.high %v440_v48, %v444_v49  ;;  %v272_v42 = vld [vmem:[%s5071_s9 + $0x58] sm:$0xff]  ;;  %v4189_v49 = vcombine.low %v280_v33, %v284_v55 }
 0x1d7   : > { %3808 = vmatpush2.bf16.msra.mxu0 %v4523_v61  ;;  %v436_v61 = vld [vmem:[%s5071_s9 + $0x578] sm:$0xff] }
 0x1d8   : > { %3809 = vmatprep.subr.bf16.mxu0 %v4516_v63  ;;  %v404_v48 = vld [vmem:[%s5071_s9 + $0x478] sm:$0xff] }
 0x1d9   : > { %3849 = vmatpush2.bf16.msra.mxu1 %v4651_v62 }
 0x1da   : > { %3850 = vmatprep.subr.bf16.mxu1 %v4644_v0  ;;  %v4221_v0 = vcombine.low %v312_v43, %v316_v46  ;;  %v276_v43 = vld [vmem:[%s5071_s9 + $0x78] sm:$0xff] }
 0x1db   : > { %3810 = vmatpush2.bf16.msra.mxu0 %v4515_v8  ;;  %v400_v46 = vld [vmem:[%s5071_s9 + $0x458] sm:$0xff] }
 0x1dc   : > { %3811 = vmatprep.subr.bf16.mxu0 %v4508_v10  ;;  %v296_v10 = vld [vmem:[%s5071_s9 + $0x118] sm:$0xff] }
 0x1dd   : > { %3851 = vmatpush2.bf16.msra.mxu1 %v4643_v9  ;;  %v4342_v9 = vcombine.high %v432_v60, %v436_v61 }
 0x1de   : > { %3852 = vmatprep.subr.bf16.mxu1 %v4636_v11  ;;  %v300_v11 = vld [vmem:[%s5071_s9 + $0x138] sm:$0xff] }
 0x1df   : > { %3812 = vmatpush2.bf16.msra.mxu0 %v4507_v17  ;;  %v4206_v21 = vcombine.high %v296_v10, %v300_v11 }
 0x1e0   : > { %3813 = vmatprep.subr.bf16.mxu0 %v4500_v19 }
 0x1e1   : > { %3853 = vmatpush2.bf16.msra.mxu1 %v4635_v18  ;;  %v4213_v18 = vcombine.low %v304_v57, %v308_v58  ;;  %v396_v57 = vld [vmem:[%s5071_s9 + $0x438] sm:$0xff]  ;;  %v4181_v58 = vcombine.low %v272_v42, %v276_v43 }
 0x1e2   : > { %3854 = vmatprep.subr.bf16.mxu1 %v4628_v20  ;;  %v4341_v20 = vcombine.low %v432_v60, %v436_v61 }
 0x1e3   : > { %3814 = vmatpush2.bf16.msra.mxu0 %v4499_v26  ;;  %v420_v26 = vld [vmem:[%s5071_s9 + $0x4f8] sm:$0xff] }
 0x1e4   : > { %3815 = vmatprep.subr.bf16.mxu0 %v4492_v29  ;;  %v4333_v29 = vcombine.low %v424_v13, %v428_v14  ;;  %v4326_v31 = vcombine.high %v416_v45, %v420_v26 }
 0x1e5   : > { %3855 = vmatpush2.bf16.msra.mxu1 %v4627_v27  ;;  %v4205_v27 = vcombine.low %v296_v10, %v300_v11  ;;  %v380_v10 = vld [vmem:[%s5071_s9 + $0x3b8] sm:$0xff] }
 0x1e6   : > { %3856 = vmatprep.subr.bf16.mxu1 %v4620_v30  ;;  %v504_v11 = vld [vmem:[%s5071_s9 + $0x798] sm:$0xff] }
 0x1e7   : > { %3816 = vmatpush2.bf16.msra.mxu0 %v4491_v35  ;;  %v412_v35 = vld [vmem:[%s5071_s9 + $0x4b8] sm:$0xff] }
 0x1e8   : > { %3867 = vmatprep.subr.bf16.mxu0 %v4230_v40  ;;  %v4190_v40 = vcombine.high %v280_v33, %v284_v55 }
 0x1e9   : > { %3857 = vmatpush2.bf16.msra.mxu1 %v4619_v38  ;;  %v4325_v38 = vcombine.low %v416_v45, %v420_v26  ;;  %v360_v26 = vld [vmem:[%s5071_s9 + $0x318] sm:$0xff] }
 0x1ea   : > { %3908 = vmatprep.subr.bf16.mxu1 %v4358_v41  ;;  %v3573_v59 = vpop.f32.mrf.mxu0  ;;  %3818 = vmatmul.mubr.bf16.vlgmr.msra.gmra.mxu0 %v5234_v44  ;;  %v4318_v41 = vcombine.high %v408_v34, %v412_v35 }
 0x1eb   : > { %v3574_v62 = vadd.f32 %v3573_v59, %v786_v50  ;;  %3868 = vmatpush1.bf16.msra.mxu0 %v4229_v51  ;;  %3899 = vmatprep.mubr.bf16.mxu0 %v5112_v2  ;;  %v4317_v50 = vcombine.low %v408_v34, %v412_v35  ;;  %v4182_v51 = vcombine.high %v272_v42, %v276_v43  ;;  %v352_v35 = vld [vmem:[%s5071_s9 + $0x2d8] sm:$0xff] }
 0x1ec   : > { %v3614_v63 = vpop.f32.mrf.mxu1  ;;  %3859 = vmatmul.mubr.bf16.vlgmr.msra.gmra.mxu1 %v5238_v47  ;;  %v3575_v15 = vpop.f32.mrf.mxu0  ;;  %3869 = vmatprep.subr.bf16.mxu0 %v4222_v53  ;;  %v264_v53 = vld [vmem:[%s5071_s9 + $0x18] sm:$0xff]  ;;  %v4309_v59 = vcombine.low %v400_v46, %v404_v48 }
 0x1ed   : > { %3909 = vmatpush1.bf16.msra.mxu1 %v4357_v52  ;;  %v5542_v6 = vadd.f32 %v3614_v63, %v3574_v62  ;;  %v3576_v7 = vadd.f32 %v3575_v15, %v790_v54  ;;  %3940 = vmatprep.mubr.bf16.mxu1 %v5114_v3  ;;  %v292_v3 = vld [vmem:[%s5071_s9 + $0xf8] sm:$0xff]  ;;  %v4310_v52 = vcombine.high %v400_v46, %v404_v48 }
 0x1ee   : > { %v3616_v8 = vpop.f32.mrf.mxu1  ;;  %3910 = vmatprep.subr.bf16.mxu1 %v4350_v56  ;;  %v3577_v12 = vpop.f32.mrf.mxu0  ;;  %v4198_v30 = vcombine.high %v288_v25, %v292_v3  ;;  %v4197_v37 = vcombine.low %v288_v25, %v292_v3  ;;  %v268_v54 = vld [vmem:[%s5071_s9 + $0x38] sm:$0xff] }
 0x1ef   : > { %v5550_v16 = vadd.f32 %v3616_v8, %v3576_v7  ;;  %3870 = vmatpush1.bf16.msra.mxu0 %v4221_v0  ;;  %v392_v56 = vld [vmem:[%s5071_s9 + $0x418] sm:$0xff]  ;;  %v4174_v60 = vcombine.high %v264_v53, %v268_v54 }
 0x1f0   : > { %v3618_v17 = vpop.f32.mrf.mxu1  ;;  %v3578_v19 = vpop.f32.mrf.mxu0  ;;  %3871 = vmatprep.subr.bf16.mxu0 %v4214_v5  ;;  %v4302_v61 = vcombine.high %v392_v56, %v396_v57  ;;  %v384_v62 = vld [vmem:[%s5071_s9 + $0x3d8] sm:$0xff]  ;;  %v4301_v5 = vcombine.low %v392_v56, %v396_v57 }
 0x1f1   : > { %3911 = vmatpush1.bf16.msra.mxu1 %v4349_v1  ;;  %v388_v63 = vld [vmem:[%s5071_s9 + $0x3f8] sm:$0xff]  ;;  %v4173_v1 = vcombine.low %v264_v53, %v268_v54 }
 0x1f2   : > { %v3619_v2 = vpop.f32.mrf.mxu1  ;;  %3912 = vmatprep.subr.bf16.mxu1 %v4342_v9  ;;  %v512_v0 = vld [vmem:[%s5071_s9 + $0x7d8] sm:$0xff]  ;;  %v4294_v7 = vcombine.high %v384_v62, %v388_v63  ;;  %v4293_v13 = vcombine.low %v384_v62, %v388_v63 }
 0x1f3   : > { %3872 = vmatpush1.bf16.msra.mxu0 %v4213_v18  ;;  %v516_v15 = vld [vmem:[%s5071_s9 + $0x7f8] sm:$0xff] }
 0x1f4   : > { %3873 = vmatprep.subr.bf16.mxu0 %v4206_v21  ;;  %v4422_v8 = vcombine.high %v512_v0, %v516_v15  ;;  %v376_v9 = vld [vmem:[%s5071_s9 + $0x398] sm:$0xff]  ;;  %v4421_v14 = vcombine.low %v512_v0, %v516_v15 }
 0x1f5   : > { %3913 = vmatpush1.bf16.msra.mxu1 %v4341_v20  ;;  %v508_v12 = vld [vmem:[%s5071_s9 + $0x7b8] sm:$0xff]  ;;  %v4286_v17 = vcombine.high %v376_v9, %v380_v10 }
 0x1f6   : > { %3914 = vmatprep.subr.bf16.mxu1 %v4334_v23  ;;  %v4414_v18 = vcombine.high %v504_v11, %v508_v12  ;;  %v368_v19 = vld [vmem:[%s5071_s9 + $0x358] sm:$0xff]  ;;  %v4285_v23 = vcombine.low %v376_v9, %v380_v10  ;;  %v4413_v25 = vcombine.low %v504_v11, %v508_v12 }
 0x1f7   : > { %3874 = vmatpush1.bf16.msra.mxu0 %v4205_v27  ;;  %v372_v20 = vld [vmem:[%s5071_s9 + $0x378] sm:$0xff] }
 0x1f8   : > { %3875 = vmatprep.subr.bf16.mxu0 %v4198_v30  ;;  %v496_v21 = vld [vmem:[%s5071_s9 + $0x758] sm:$0xff]  ;;  %v4278_v3 = vcombine.high %v368_v19, %v372_v20 }
 0x1f9   : > { %3915 = vmatpush1.bf16.msra.mxu1 %v4333_v29  ;;  %v500_v2 = vld [vmem:[%s5071_s9 + $0x778] sm:$0xff] }
 0x1fa   : > { %3916 = vmatprep.subr.bf16.mxu1 %v4326_v31  ;;  %v4406_v45 = vcombine.high %v496_v21, %v500_v2  ;;  %v364_v27 = vld [vmem:[%s5071_s9 + $0x338] sm:$0xff]  ;;  %v4277_v31 = vcombine.low %v368_v19, %v372_v20  ;;  %v4405_v33 = vcombine.low %v496_v21, %v500_v2 }
 0x1fb   : > { %3876 = vmatpush1.bf16.msra.mxu0 %v4197_v37  ;;  %v488_v29 = vld [vmem:[%s5071_s9 + $0x718] sm:$0xff]  ;;  %v4270_v55 = vcombine.high %v360_v26, %v364_v27 }
 0x1fc   : > { %3877 = vmatprep.subr.bf16.mxu0 %v4190_v40  ;;  %v492_v30 = vld [vmem:[%s5071_s9 + $0x738] sm:$0xff] }
 0x1fd   : > { %3917 = vmatpush1.bf16.msra.mxu1 %v4325_v38  ;;  %v4398_v34 = vcombine.high %v488_v29, %v492_v30  ;;  %v356_v37 = vld [vmem:[%s5071_s9 + $0x2f8] sm:$0xff]  ;;  %v4397_v42 = vcombine.low %v488_v29, %v492_v30 }
 0x1fe   : > { %3918 = vmatprep.subr.bf16.mxu1 %v4318_v41  ;;  %v480_v38 = vld [vmem:[%s5071_s9 + $0x6d8] sm:$0xff]  ;;  %v4269_v41 = vcombine.low %v360_v26, %v364_v27  ;;  %v4262_v43 = vcombine.high %v352_v35, %v356_v37 }
 0x1ff   : > { %3878 = vmatpush1.bf16.msra.mxu0 %v4189_v49  ;;  %v484_v40 = vld [vmem:[%s5071_s9 + $0x6f8] sm:$0xff] }
 0x200   : > { %3879 = vmatprep.subr.bf16.mxu0 %v4182_v51  ;;  %v4390_v46 = vcombine.high %v480_v38, %v484_v40  ;;  %v344_v48 = vld [vmem:[%s5071_s9 + $0x298] sm:$0xff]  ;;  %v4389_v53 = vcombine.low %v480_v38, %v484_v40 }
 0x201   : > { %3919 = vmatpush1.bf16.msra.mxu1 %v4317_v50  ;;  %v348_v49 = vld [vmem:[%s5071_s9 + $0x2b8] sm:$0xff] }
 0x202   : > { %3920 = vmatprep.subr.bf16.mxu1 %v4310_v52  ;;  %v472_v50 = vld [vmem:[%s5071_s9 + $0x698] sm:$0xff]  ;;  %v4261_v52 = vcombine.low %v352_v35, %v356_v37  ;;  %v4254_v54 = vcombine.high %v344_v48, %v348_v49 }
 0x203   : > { %3880 = vmatpush1.bf16.msra.mxu0 %v4181_v58  ;;  %v476_v51 = vld [vmem:[%s5071_s9 + $0x6b8] sm:$0xff] }
 0x204   : > { %3881 = vmatprep.subr.bf16.mxu0 %v4174_v60  ;;  %v4382_v56 = vcombine.high %v472_v50, %v476_v51  ;;  %v336_v57 = vld [vmem:[%s5071_s9 + $0x258] sm:$0xff]  ;;  %v4381_v62 = vcombine.low %v472_v50, %v476_v51 }
 0x205   : > { %3921 = vmatpush1.bf16.msra.mxu1 %v4309_v59  ;;  %v340_v58 = vld [vmem:[%s5071_s9 + $0x278] sm:$0xff] }
 0x206   : > { %3922 = vmatprep.subr.bf16.mxu1 %v4302_v61  ;;  %v464_v59 = vld [vmem:[%s5071_s9 + $0x658] sm:$0xff]  ;;  %v4253_v61 = vcombine.low %v344_v48, %v348_v49  ;;  %v4246_v63 = vcombine.high %v336_v57, %v340_v58 }
 0x207   : > { %3882 = vmatpush1.bf16.msra.mxu0 %v4173_v1  ;;  %v468_v60 = vld [vmem:[%s5071_s9 + $0x678] sm:$0xff] }
 0x208   : > { %3883 = vmatprep.subr.bf16.mxu0 %v4294_v7  ;;  %v4374_v0 = vcombine.high %v464_v59, %v468_v60  ;;  %v328_v15 = vld [vmem:[%s5071_s9 + $0x218] sm:$0xff]  ;;  %v4373_v9 = vcombine.low %v464_v59, %v468_v60 }
 0x209   : > { %3923 = vmatpush1.bf16.msra.mxu1 %v4301_v5  ;;  %v332_v1 = vld [vmem:[%s5071_s9 + $0x238] sm:$0xff] }
 0x20a   : > { %3924 = vmatprep.subr.bf16.mxu1 %v4422_v8  ;;  %v456_v5 = vld [vmem:[%s5071_s9 + $0x618] sm:$0xff]  ;;  %v4245_v8 = vcombine.low %v336_v57, %v340_v58  ;;  %v4238_v10 = vcombine.high %v328_v15, %v332_v1 }
 0x20b   : > { %3884 = vmatpush2.bf16.msra.mxu0 %v4293_v13  ;;  %v460_v7 = vld [vmem:[%s5071_s9 + $0x638] sm:$0xff] }
 0x20c   : > { %3885 = vmatprep.subr.bf16.mxu0 %v4286_v17  ;;  %v4366_v11 = vcombine.high %v456_v5, %v460_v7  ;;  %v576_v12 = vld [vmem:[%s5071_s9 + $0x9d8] sm:$0xff]  ;;  %v4365_v19 = vcombine.low %v456_v5, %v460_v7 }
 0x20d   : > { %3925 = vmatpush2.bf16.msra.mxu1 %v4421_v14  ;;  %v580_v13 = vld [vmem:[%s5071_s9 + $0x9f8] sm:$0xff] }
 0x20e   : > { %3926 = vmatprep.subr.bf16.mxu1 %v4414_v18  ;;  %v704_v14 = vld [vmem:[%s5071_s9 + $0xdd8] sm:$0xff]  ;;  %v4237_v18 = vcombine.low %v328_v15, %v332_v1  ;;  %v4486_v20 = vcombine.high %v576_v12, %v580_v13 }
 0x20f   : > { %3886 = vmatpush2.bf16.msra.mxu0 %v4285_v23  ;;  %v708_v17 = vld [vmem:[%s5071_s9 + $0xdf8] sm:$0xff] }
 0x210   : > { %3887 = vmatprep.subr.bf16.mxu0 %v4278_v3  ;;  %v4614_v21 = vcombine.high %v704_v14, %v708_v17  ;;  %v568_v2 = vld [vmem:[%s5071_s9 + $0x998] sm:$0xff]  ;;  %v4613_v26 = vcombine.low %v704_v14, %v708_v17 }
 0x211   : > { %3927 = vmatpush2.bf16.msra.mxu1 %v4413_v25  ;;  %v572_v23 = vld [vmem:[%s5071_s9 + $0x9b8] sm:$0xff] }
 0x212   : > { %3928 = vmatprep.subr.bf16.mxu1 %v4406_v45  ;;  %v696_v25 = vld [vmem:[%s5071_s9 + $0xd98] sm:$0xff]  ;;  %v4485_v45 = vcombine.low %v576_v12, %v580_v13  ;;  %v4478_v27 = vcombine.high %v568_v2, %v572_v23  ;;  %v4477_v38 = vcombine.low %v568_v2, %v572_v23 }
 0x213   : > { %3888 = vmatpush2.bf16.msra.mxu0 %v4277_v31  ;;  %v700_v3 = vld [vmem:[%s5071_s9 + $0xdb8] sm:$0xff] }
 0x214   : > { %3889 = vmatprep.subr.bf16.mxu0 %v4270_v55  ;;  %v4606_v29 = vcombine.high %v696_v25, %v700_v3  ;;  %v560_v30 = vld [vmem:[%s5071_s9 + $0x958] sm:$0xff] }
 0x215   : > { %3929 = vmatpush2.bf16.msra.mxu1 %v4405_v33  ;;  %v564_v31 = vld [vmem:[%s5071_s9 + $0x978] sm:$0xff] }
 0x216   : > { %3930 = vmatprep.subr.bf16.mxu1 %v4398_v34  ;;  %v688_v55 = vld [vmem:[%s5071_s9 + $0xd58] sm:$0xff] }
 0x217   : > { %3890 = vmatpush2.bf16.msra.mxu0 %v4269_v41  ;;  %v692_v34 = vld [vmem:[%s5071_s9 + $0xd78] sm:$0xff]  ;;  %v4605_v41 = vcombine.low %v696_v25, %v700_v3 }
 0x218   : > { %3891 = vmatprep.subr.bf16.mxu0 %v4262_v43  ;;  %v552_v48 = vld [vmem:[%s5071_s9 + $0x918] sm:$0xff] }
 0x219   : > { %3931 = vmatpush2.bf16.msra.mxu1 %v4397_v42  ;;  %v4470_v42 = vcombine.high %v560_v30, %v564_v31  ;;  %v556_v49 = vld [vmem:[%s5071_s9 + $0x938] sm:$0xff] }
 0x21a   : > { %3932 = vmatprep.subr.bf16.mxu1 %v4390_v46  ;;  %v680_v50 = vld [vmem:[%s5071_s9 + $0xd18] sm:$0xff]  ;;  %v4462_v57 = vcombine.high %v552_v48, %v556_v49 }
 0x21b   : > { %3892 = vmatpush2.bf16.msra.mxu0 %v4261_v52  ;;  %v684_v51 = vld [vmem:[%s5071_s9 + $0xd38] sm:$0xff] }
 0x21c   : > { %3893 = vmatprep.subr.bf16.mxu0 %v4254_v54  ;;  %v4590_v58 = vcombine.high %v680_v50, %v684_v51  ;;  %v544_v59 = vld [vmem:[%s5071_s9 + $0x8d8] sm:$0xff] }
 0x21d   : > { %3933 = vmatpush2.bf16.msra.mxu1 %v4389_v53  ;;  %v672_v60 = vld [vmem:[%s5071_s9 + $0xcd8] sm:$0xff] }
 0x21e   : > { %3934 = vmatprep.subr.bf16.mxu1 %v4382_v56  ;;  %v4597_v56 = vcombine.low %v688_v55, %v692_v34  ;;  %v536_v1 = vld [vmem:[%s5071_s9 + $0x898] sm:$0xff] }
 0x21f   : > { %3894 = vmatpush2.bf16.msra.mxu0 %v4253_v61  ;;  %v676_v61 = vld [vmem:[%s5071_s9 + $0xcf8] sm:$0xff] }
 0x220   : > { %3895 = vmatprep.subr.bf16.mxu0 %v4246_v63  ;;  %v4589_v63 = vcombine.low %v680_v50, %v684_v51  ;;  %v4582_v15 = vcombine.high %v672_v60, %v676_v61  ;;  %v540_v5 = vld [vmem:[%s5071_s9 + $0x8b8] sm:$0xff] }
 0x221   : > { %3935 = vmatpush2.bf16.msra.mxu1 %v4381_v62  ;;  %v4461_v62 = vcombine.low %v552_v48, %v556_v49  ;;  %v664_v7 = vld [vmem:[%s5071_s9 + $0xc98] sm:$0xff] }
 0x222   : > { %3936 = vmatprep.subr.bf16.mxu1 %v4374_v0  ;;  %v528_v13 = vld [vmem:[%s5071_s9 + $0x858] sm:$0xff] }
 0x223   : > { %3896 = vmatpush2.bf16.msra.mxu0 %v4245_v8  ;;  %v668_v8 = vld [vmem:[%s5071_s9 + $0xcb8] sm:$0xff] }
 0x224   : > { %3897 = vmatprep.subr.bf16.mxu0 %v4238_v10  ;;  %v4581_v10 = vcombine.low %v672_v60, %v676_v61  ;;  %v4574_v12 = vcombine.high %v664_v7, %v668_v8  ;;  %v532_v14 = vld [vmem:[%s5071_s9 + $0x878] sm:$0xff] }
 0x225   : > { %3937 = vmatpush2.bf16.msra.mxu1 %v4373_v9  ;;  %v656_v17 = vld [vmem:[%s5071_s9 + $0xc58] sm:$0xff] }
 0x226   : > { %3938 = vmatprep.subr.bf16.mxu1 %v4366_v11  ;;  %v4446_v11 = vcombine.high %v536_v1, %v540_v5  ;;  %v520_v23 = vld [vmem:[%s5071_s9 + $0x818] sm:$0xff] }
 0x227   : > { %3898 = vmatpush2.bf16.msra.mxu0 %v4237_v18  ;;  %v660_v18 = vld [vmem:[%s5071_s9 + $0xc78] sm:$0xff] }
 0x228   : > { %3949 = vmatprep.subr.bf16.mxu0 %v4486_v20  ;;  %v4573_v20 = vcombine.low %v664_v7, %v668_v8  ;;  %v4566_v2 = vcombine.high %v656_v17, %v660_v18  ;;  %v524_v25 = vld [vmem:[%s5071_s9 + $0x838] sm:$0xff] }
 0x229   : > { %3939 = vmatpush2.bf16.msra.mxu1 %v4365_v19  ;;  %v4445_v19 = vcombine.low %v536_v1, %v540_v5  ;;  %v648_v3 = vld [vmem:[%s5071_s9 + $0xc18] sm:$0xff] }
 0x22a   : > { %3990 = vmatprep.subr.bf16.mxu1 %v4614_v21  ;;  %v3655_v33 = vpop.f32.mrf.mxu0  ;;  %3900 = vmatmul.mubr.bf16.vlgmr.msra.gmra.mxu0 %v5158_v24  ;;  %v4438_v21 = vcombine.high %v528_v13, %v532_v14  ;;  %v624_v50 = vld [vmem:[%s5071_s9 + $0xb58] sm:$0xff] }
 0x22b   : > { %v3656_v35 = vadd.f32 %v3655_v33, %v5542_v6  ;;  %3950 = vmatpush1.bf16.msra.mxu0 %v4485_v45  ;;  %v4598_v6 = vcombine.high %v688_v55, %v692_v34  ;;  %3981 = vmatprep.mubr.bf16.mxu0 %v5166_v36  ;;  %v652_v45 = vld [vmem:[%s5071_s9 + $0xc38] sm:$0xff] }
 0x22c   : > { %v3696_v37 = vpop.f32.mrf.mxu1  ;;  %3941 = vmatmul.mubr.bf16.vlgmr.msra.gmra.mxu1 %v5162_v28  ;;  %v3657_v40 = vpop.f32.mrf.mxu0  ;;  %3951 = vmatprep.subr.bf16.mxu0 %v4478_v27  ;;  %v4565_v27 = vcombine.low %v656_v17, %v660_v18  ;;  %v644_v33 = vld [vmem:[%s5071_s9 + $0xbf8] sm:$0xff] }
 0x22d   : > { %3991 = vmatpush1.bf16.msra.mxu1 %v4613_v26  ;;  %v5615_v43 = vadd.f32 %v3696_v37, %v3656_v35  ;;  %v3658_v24 = vadd.f32 %v3657_v40, %v5550_v16  ;;  %4022 = vmatprep.mubr.bf16.mxu1 %v5171_v39  ;;  %v4469_v16 = vcombine.low %v560_v30, %v564_v31  ;;  %v548_v39 = vld [vmem:[%s5071_s9 + $0x8f8] sm:$0xff] }
 0x22e   : > { %v3698_v46 = vpop.f32.mrf.mxu1  ;;  %3992 = vmatprep.subr.bf16.mxu1 %v4606_v29  ;;  %v3659_v28 = vpop.f32.mrf.mxu0  ;;  %v4454_v0 = vcombine.high %v544_v59, %v548_v39  ;;  %v4453_v9 = vcombine.low %v544_v59, %v548_v39  ;;  %v4437_v26 = vcombine.low %v528_v13, %v532_v14  ;;  %v4430_v29 = vcombine.high %v520_v23, %v524_v25  ;;  %v640_v31 = vld [vmem:[%s5071_s9 + $0xbd8] sm:$0xff] }
 0x22f   : > { %v5624_v52 = vadd.f32 %v3698_v46, %v3658_v24  ;;  %3952 = vmatpush1.bf16.msra.mxu0 %v4477_v38  ;;  %v4558_v30 = vcombine.high %v648_v3, %v652_v45  ;;  %v768_v55 = vld [vmem:[%s5071_s9 + $0xfd8] sm:$0xff]  ;;  %v4429_v35 = vcombine.low %v520_v23, %v524_v25  ;;  %v4557_v37 = vcombine.low %v648_v3, %v652_v45 }
 0x230   : > { %v3700_v53 = vpop.f32.mrf.mxu1  ;;  %v3660_v54 = vpop.f32.mrf.mxu0  ;;  %3953 = vmatprep.subr.bf16.mxu0 %v4470_v42  ;;  %v772_v34 = vld [vmem:[%s5071_s9 + $0xff8] sm:$0xff]  ;;  %v4550_v38 = vcombine.high %v640_v31, %v644_v33 }
 0x231   : > { %3993 = vmatpush1.bf16.msra.mxu1 %v4605_v41  ;;  %v4678_v40 = vcombine.high %v768_v55, %v772_v34  ;;  %v632_v41 = vld [vmem:[%s5071_s9 + $0xb98] sm:$0xff]  ;;  %v4677_v48 = vcombine.low %v768_v55, %v772_v34 }
 0x232   : > { %v3701_v36 = vpop.f32.mrf.mxu1  ;;  %3994 = vmatprep.subr.bf16.mxu1 %v4598_v6  ;;  %v636_v42 = vld [vmem:[%s5071_s9 + $0xbb8] sm:$0xff]  ;;  %v4549_v6 = vcombine.low %v640_v31, %v644_v33 }
 0x233   : > { %3954 = vmatpush1.bf16.msra.mxu0 %v4469_v16  ;;  %v760_v24 = vld [vmem:[%s5071_s9 + $0xf98] sm:$0xff]  ;;  %v4542_v49 = vcombine.high %v632_v41, %v636_v42  ;;  %v4541_v54 = vcombine.low %v632_v41, %v636_v42  ;;  %v793_v41 = vsub.s32 4, %v5368_v4 }
 0x234   : > { %3955 = vmatprep.subr.bf16.mxu0 %v4462_v57  ;;  %v764_v46 = vld [vmem:[%s5071_s9 + $0xfb8] sm:$0xff] }
 0x235   : > { %3995 = vmatpush1.bf16.msra.mxu1 %v4597_v56  ;;  %v4670_v28 = vcombine.high %v760_v24, %v764_v46  ;;  %v628_v51 = vld [vmem:[%s5071_s9 + $0xb78] sm:$0xff]  ;;  %v4669_v56 = vcombine.low %v760_v24, %v764_v46  ;;  %v797_v24 = vsub.s32 5, %v5368_v4  ;;  %v4751_v46 = vld [vmem:[%s202_s25] sm:$0xff] }
 0x236   : > { %3996 = vmatprep.subr.bf16.mxu1 %v4590_v58  ;;  %v752_v53 = vld [vmem:[%s5071_s9 + $0xf58] sm:$0xff]  ;;  %v4534_v57 = vcombine.high %v624_v50, %v628_v51  ;;  %v4533_v61 = vcombine.low %v624_v50, %v628_v51 }
 0x237   : > { %3956 = vmatpush1.bf16.msra.mxu0 %v4461_v62  ;;  %v756_v16 = vld [vmem:[%s5071_s9 + $0xf78] sm:$0xff] }
 0x238   : > { %3957 = vmatprep.subr.bf16.mxu0 %v4454_v0  ;;  %v4662_v36 = vcombine.high %v752_v53, %v756_v16  ;;  %v616_v58 = vld [vmem:[%s5071_s9 + $0xb18] sm:$0xff]  ;;  %v4661_v62 = vcombine.low %v752_v53, %v756_v16 }
 0x239   : > { %3997 = vmatpush1.bf16.msra.mxu1 %v4589_v63  ;;  %v620_v59 = vld [vmem:[%s5071_s9 + $0xb38] sm:$0xff] }
 0x23a   : > { %3998 = vmatprep.subr.bf16.mxu1 %v4582_v15  ;;  %v744_v39 = vld [vmem:[%s5071_s9 + $0xf18] sm:$0xff]  ;;  %v4526_v63 = vcombine.high %v616_v58, %v620_v59  ;;  %v4525_v8 = vcombine.low %v616_v58, %v620_v59 }
 0x23b   : > { %3958 = vmatpush1.bf16.msra.mxu0 %v4453_v9  ;;  %v748_v60 = vld [vmem:[%s5071_s9 + $0xf38] sm:$0xff] }
 0x23c   : > { %3959 = vmatprep.subr.bf16.mxu0 %v4446_v11  ;;  %v4654_v0 = vcombine.high %v744_v39, %v748_v60  ;;  %v608_v15 = vld [vmem:[%s5071_s9 + $0xad8] sm:$0xff]  ;;  %v4653_v9 = vcombine.low %v744_v39, %v748_v60 }
 0x23d   : > { %3999 = vmatpush1.bf16.msra.mxu1 %v4581_v10  ;;  %v612_v1 = vld [vmem:[%s5071_s9 + $0xaf8] sm:$0xff] }
 0x23e   : > { %4000 = vmatprep.subr.bf16.mxu1 %v4574_v12  ;;  %v736_v5 = vld [vmem:[%s5071_s9 + $0xed8] sm:$0xff]  ;;  %v4518_v10 = vcombine.high %v608_v15, %v612_v1  ;;  %v4517_v18 = vcombine.low %v608_v15, %v612_v1 }
 0x23f   : > { %3960 = vmatpush1.bf16.msra.mxu0 %v4445_v19  ;;  %v740_v7 = vld [vmem:[%s5071_s9 + $0xef8] sm:$0xff] }
 0x240   : > { %3961 = vmatprep.subr.bf16.mxu0 %v4438_v21  ;;  %v4646_v11 = vcombine.high %v736_v5, %v740_v7  ;;  %v600_v12 = vld [vmem:[%s5071_s9 + $0xa98] sm:$0xff]  ;;  %v4645_v19 = vcombine.low %v736_v5, %v740_v7 }
 0x241   : > { %4001 = vmatpush1.bf16.msra.mxu1 %v4573_v20  ;;  %v604_v13 = vld [vmem:[%s5071_s9 + $0xab8] sm:$0xff] }
 0x242   : > { %4002 = vmatprep.subr.bf16.mxu1 %v4566_v2  ;;  %v728_v14 = vld [vmem:[%s5071_s9 + $0xe98] sm:$0xff]  ;;  %v4510_v20 = vcombine.high %v600_v12, %v604_v13  ;;  %v4509_v45 = vcombine.low %v600_v12, %v604_v13 }
 0x243   : > { %3962 = vmatpush1.bf16.msra.mxu0 %v4437_v26  ;;  %v732_v17 = vld [vmem:[%s5071_s9 + $0xeb8] sm:$0xff] }
 0x244   : > { %3963 = vmatprep.subr.bf16.mxu0 %v4430_v29  ;;  %v4638_v21 = vcombine.high %v728_v14, %v732_v17  ;;  %v592_v2 = vld [vmem:[%s5071_s9 + $0xa58] sm:$0xff]  ;;  %v4637_v26 = vcombine.low %v728_v14, %v732_v17 }
 0x245   : > { %4003 = vmatpush1.bf16.msra.mxu1 %v4565_v27  ;;  %v596_v23 = vld [vmem:[%s5071_s9 + $0xa78] sm:$0xff] }
 0x246   : > { %4004 = vmatprep.subr.bf16.mxu1 %v4558_v30  ;;  %v720_v25 = vld [vmem:[%s5071_s9 + $0xe58] sm:$0xff]  ;;  %v4502_v27 = vcombine.high %v592_v2, %v596_v23  ;;  %v4501_v34 = vcombine.low %v592_v2, %v596_v23  ;;  %v805_v2 = vsub.s32 7, %v5368_v4 }
 0x247   : > { %3964 = vmatpush1.bf16.msra.mxu0 %v4429_v35  ;;  %v724_v3 = vld [vmem:[%s5071_s9 + $0xe78] sm:$0xff] }
 0x248   : > { %3965 = vmatprep.subr.bf16.mxu0 %v4550_v38  ;;  %v4630_v29 = vcombine.high %v720_v25, %v724_v3  ;;  %v584_v30 = vld [vmem:[%s5071_s9 + $0xa18] sm:$0xff]  ;;  %v4629_v35 = vcombine.low %v720_v25, %v724_v3  ;;  %v806_v23 = vrot.slane %v4751_v46, %v805_v2 }
 0x249   : > { %4005 = vmatpush1.bf16.msra.mxu1 %v4557_v37  ;;  %v588_v31 = vld [vmem:[%s5071_s9 + $0xa38] sm:$0xff] }
 0x24a   : > { %4006 = vmatprep.subr.bf16.mxu1 %v4678_v40  ;;  %v712_v33 = vld [vmem:[%s5071_s9 + $0xe18] sm:$0xff]  ;;  %v4494_v37 = vcombine.high %v584_v30, %v588_v31  ;;  %v4493_v40 = vcombine.low %v584_v30, %v588_v31 }
 0x24b   : > { %3966 = vmatpush2.bf16.msra.mxu0 %v4549_v6  ;;  %v716_v55 = vld [vmem:[%s5071_s9 + $0xe38] sm:$0xff]  ;;  %v794_v6 = vrot.slane %v4751_v46, %v793_v41 }
 0x24c   : > { %3967 = vmatprep.subr.bf16.mxu0 %v4542_v49  ;;  %v4622_v38 = vcombine.high %v712_v33, %v716_v55  ;;  %v4621_v42 = vcombine.low %v712_v33, %v716_v55 }
 0x24d   : > { %4007 = vmatpush2.bf16.msra.mxu1 %v4677_v48  ;;  %v798_v48 = vrot.slane %v4751_v46, %v797_v24 }
 0x24e   : > { %4008 = vmatprep.subr.bf16.mxu1 %v4670_v28 }
 0x24f   : > { %3968 = vmatpush2.bf16.msra.mxu0 %v4541_v54 }
 0x250   : > { %3969 = vmatprep.subr.bf16.mxu0 %v4534_v57 }
 0x251   : > { %4009 = vmatpush2.bf16.msra.mxu1 %v4669_v56 }
 0x252   : > { %4010 = vmatprep.subr.bf16.mxu1 %v4662_v36 }
 0x253   : > { %3970 = vmatpush2.bf16.msra.mxu0 %v4533_v61 }
 0x254   : > { %3971 = vmatprep.subr.bf16.mxu0 %v4526_v63 }
 0x255   : > { %4011 = vmatpush2.bf16.msra.mxu1 %v4661_v62 }
 0x256   : > { %4012 = vmatprep.subr.bf16.mxu1 %v4654_v0 }
 0x257   : > { %3972 = vmatpush2.bf16.msra.mxu0 %v4525_v8  ;;  %v801_v8 = vsub.s32 6, %v5368_v4 }
 0x258   : > { %3973 = vmatprep.subr.bf16.mxu0 %v4518_v10 }
 0x259   : > { %4013 = vmatpush2.bf16.msra.mxu1 %v4653_v9  ;;  %v802_v9 = vrot.slane %v4751_v46, %v801_v8 }
 0x25a   : > { %4014 = vmatprep.subr.bf16.mxu1 %v4646_v11 }
 0x25b   : > { %3974 = vmatpush2.bf16.msra.mxu0 %v4517_v18 }
 0x25c   : > { %3975 = vmatprep.subr.bf16.mxu0 %v4510_v20 }
 0x25d   : > { %4015 = vmatpush2.bf16.msra.mxu1 %v4645_v19 }
 0x25e   : > { %4016 = vmatprep.subr.bf16.mxu1 %v4638_v21 }
 0x25f   : > { %3976 = vmatpush2.bf16.msra.mxu0 %v4509_v45 }
 0x260   : > { %3977 = vmatprep.subr.bf16.mxu0 %v4502_v27 }
 0x261   : > { %4017 = vmatpush2.bf16.msra.mxu1 %v4637_v26 }
 0x262   : > { %4018 = vmatprep.subr.bf16.mxu1 %v4630_v29 }
 0x263   : > { %3978 = vmatpush2.bf16.msra.mxu0 %v4501_v34 }
 0x264   : > { %3979 = vmatprep.subr.bf16.mxu0 %v4494_v37 }
 0x265   : > { %4019 = vmatpush2.bf16.msra.mxu1 %v4629_v35 }
 0x266   : > { %4020 = vmatprep.subr.bf16.mxu1 %v4622_v38 }
 0x267   : > { %3980 = vmatpush2.bf16.msra.mxu0 %v4493_v40 }
 0x269   : > { %4021 = vmatpush2.bf16.msra.mxu1 %v4621_v42 }
 0x26a   : > { %v3737_v49 = vpop.f32.mrf.mxu0  ;;  %3982 = vmatmul.mubr.bf16.vlgmr.msra.gmra.mxu0 %v5234_v44 }
 0x26b   : > { %v3738_v28 = vadd.f32 %v3737_v49, %v794_v6 }
 0x26c   : > { %v3778_v50 = vpop.f32.mrf.mxu1  ;;  %4023 = vmatmul.mubr.bf16.vlgmr.msra.gmra.mxu1 %v5238_v47  ;;  %v3739_v51 = vpop.f32.mrf.mxu0 }
 0x26d   : > { %v3779_v53 = vadd.f32 %v3778_v50, %v3738_v28  ;;  %v3740_v16 = vadd.f32 %v3739_v51, %v798_v48 }
 0x26e   : > { %v3780_v54 = vpop.f32.mrf.mxu1  ;;  %v3741_v56 = vpop.f32.mrf.mxu0 }
 0x26f   : > { %v3781_v57 = vadd.f32 %v3780_v54, %v3740_v16 }
 0x270   : > { %v3782_v36 = vpop.f32.mrf.mxu1  ;;  %v3742_v58 = vpop.f32.mrf.mxu0 }
 0x272   : > { %v3783_v59 = vpop.f32.mrf.mxu1 }
 0x2aa   : > { %v3819_v39 = vpop.f32.mrf.mxu0 }
 0x2ab   : > { %v3820_v60 = vadd.f32 %v3819_v39, %v3779_v53 }
 0x2ac   : > { %v3860_v61 = vpop.f32.mrf.mxu1  ;;  %v3821_v62 = vpop.f32.mrf.mxu0 }
 0x2ad   : > { %v3861_v63 = vadd.f32 %v3860_v61, %v3820_v60  ;;  %v3822_v0 = vadd.f32 %v3821_v62, %v3781_v57 }
 0x2ae   : > { %v3862_v44 = vpop.f32.mrf.mxu1  ;;  %v3823_v15 = vpop.f32.mrf.mxu0 }
 0x2af   : > { %v3863_v1 = vadd.f32 %v3862_v44, %v3822_v0 }
 0x2b0   : > { %v3864_v5 = vpop.f32.mrf.mxu1  ;;  %v3824_v47 = vpop.f32.mrf.mxu0 }
 0x2b2   : > { %v3865_v7 = vpop.f32.mrf.mxu1 }
 0x2ea   : > { %v3901_v10 = vpop.f32.mrf.mxu0 }
 0x2eb   : > { %v3902_v11 = vadd.f32 %v3901_v10, %v802_v9 }
 0x2ec   : > { %v3942_v12 = vpop.f32.mrf.mxu1  ;;  %v3903_v13 = vpop.f32.mrf.mxu0 }
 0x2ed   : > { %v3943_v14 = vadd.f32 %v3942_v12, %v3902_v11  ;;  %v3904_v25 = vadd.f32 %v3903_v13, %v806_v23 }
 0x2ee   : > { %v3944_v17 = vpop.f32.mrf.mxu1  ;;  %v3905_v18 = vpop.f32.mrf.mxu0 }
 0x2ef   : > { %v3945_v45 = vadd.f32 %v3944_v17, %v3904_v25 }
 0x2f0   : > { %v3946_v19 = vpop.f32.mrf.mxu1  ;;  %v3906_v20 = vpop.f32.mrf.mxu0 }
 0x2f2   : > { %v3947_v21 = vpop.f32.mrf.mxu1 }
 0x32a   : > { %v3983_v3 = vpop.f32.mrf.mxu0 }
 0x32b   : > { %v3984_v26 = vadd.f32 %v3983_v3, %v3943_v14 }
 0x32c   : > { %v4024_v27 = vpop.f32.mrf.mxu1  ;;  %v3985_v29 = vpop.f32.mrf.mxu0 }
 0x32d   : > { %v4025_v30 = vadd.f32 %v4024_v27, %v3984_v26  ;;  %v3986_v31 = vadd.f32 %v3985_v29, %v3945_v45 }
 0x32e   : > { %v4026_v33 = vpop.f32.mrf.mxu1  ;;  %v3987_v55 = vpop.f32.mrf.mxu0  ;;  %4034 = sbr.rel (%p4679_p1) target bundleno = 825 (0x339), region = 52 }
 0x32f   : > { %v4027_v34 = vadd.f32 %v4026_v33, %v3986_v31 }
 0x330   : > { %v4028_v35 = vpop.f32.mrf.mxu1  ;;  %v3988_v37 = vpop.f32.mrf.mxu0 }
 0x332   : > { %v4029_v38 = vpop.f32.mrf.mxu1 }
 0x333   : > { %v4035_v4 = vmax.f32 %v5465_v22, 0.0  ;;  %v4036_v40 = vmax.f32 %v5474_v32, 0.0  ;;  %v4037_v41 = vmax.f32 %v5615_v43, 0.0  ;;  %v4038_v42 = vmax.f32 %v5624_v52, 0.0 }
 0x334   : > { %v4039_v24 = vmax.f32 %v3861_v63, 0.0  ;;  %v4040_v46 = vmax.f32 %v3863_v1, 0.0  ;;  %v4041_v6 = vmax.f32 %v4025_v30, 0.0  ;;  %v4042_v48 = vmax.f32 %v4027_v34, 0.0 }
 0x335   : > { %4043 = vst [vmem:[#allocation2 + $0x30] sm:$0xff] %v4035_v4  ;;  %4044 = vst [vmem:[#allocation2] sm:$0xff] %v4036_v40 }
 0x336   : > { %4045 = vst [vmem:[#allocation2 + $0x18] sm:$0xff] %v4037_v41  ;;  %4046 = vst [vmem:[#allocation2 + $0x10] sm:$0xff] %v4038_v42 }
 0x337   : > { %4047 = vst [vmem:[#allocation2 + $0x8] sm:$0xff] %v4039_v24  ;;  %4048 = vst [vmem:[#allocation2 + $0x20] sm:$0xff] %v4040_v46 }
 0x338   : > { %4049 = vst [vmem:[#allocation2 + $0x28] sm:$0xff] %v4041_v6  ;;  %4050 = vst [vmem:[#allocation2 + $0x38] sm:$0xff] %v4042_v48 }
 0x339 PF: > { %p4680_p8 = scmp.ne.s32.totalorder %s5005_s23, 6 }
 0x33b   : > { %4054 = sbr.rel (%p4680_p8) target bundleno = 836 (0x344), region = 56 }
 0x340   : > { %4055 = vst [vmem:[#allocation9] sm:$0xff] %v5465_v22  ;;  %4056 = vst [vmem:[#allocation9 + $0x8] sm:$0xff] %v5474_v32 }
 0x341   : > { %4057 = vst [vmem:[#allocation9 + $0x10] sm:$0xff] %v5615_v43  ;;  %4058 = vst [vmem:[#allocation9 + $0x18] sm:$0xff] %v5624_v52 }
 0x342   : > { %4059 = vst [vmem:[#allocation9 + $0x20] sm:$0xff] %v3861_v63  ;;  %4060 = vst [vmem:[#allocation9 + $0x28] sm:$0xff] %v3863_v1 }
 0x343   : > { %4061 = vst [vmem:[#allocation9 + $0x30] sm:$0xff] %v4025_v30  ;;  %4062 = vst [vmem:[#allocation9 + $0x38] sm:$0xff] %v4027_v34 }
 0x344 PF: > { %p4713_p3 = scmp.eq.s32.totalorder %s5005_s23, 6  ;;  %s4907_s24 = smov [#allocation9]  }
 0x345   : > { %s4070_s5 = sshll.u32 %s4907_s24, 4  ;;  %s4071_s5 = int_to_ptr.vmem [resolvable:$true] %s4070_s5 }
 0x346   : > { %s4834_s8 = scalar_lea.vmem %s4071_s5, 1024  ;;  %p4841_p11 = scmp.lt.s32.totalorder %s4071_s5, %s4071_s5 }
 0x347   : > { %p4835_p9 = scmp.ne.s32.totalorder %s4071_s5, %s4834_s8  ;;  %p4842_p12 = scmp.lt.s32.totalorder %s4834_s8, %s4834_s8 }
 0x349   : > { %p4836_p0 = pnand %p4835_p9, %p4713_p3  ;;  %p4843_p2 = por %p4842_p12, %p4841_p11 }
 0x34b   : > { %p4837_p10 = pneg %p4836_p0 }
 0x34d   : > { %p4844_p7 = pnand %p4843_p2, %p4837_p10 }
 0x34f   : > { %4847 = shalt.err (!%p4844_p7)
}
 0x350   : > { %4696 = dma.vmem_to_hbm [thread:$0]  (%p4713_p3), %s4071_s5, 1024, %s5720_s3, [#allocation5]  }
 0x351   : > { %4883 = dma.done.wait (%p4713_p3), [#allocation5], 1024  }
 0x352   : > { %4885 = vsyncadd (%p4713_p3), [#allocation5], 4294966272 }
 0x353 PF: > { %p15_p4 = scmp.ge.s32.totalorder %s4949_s16, 9   ;;  %s5732_s12 = smov %s4892_s13 }
 0x354   : > { %s5733_s13 = smov %s4896_s14  ;;  %s5734_s14 = smov %s4959_s19 }
 0x355   : > { %s5735_s15 = smov %s4949_s16  ;;  %17 = sbr.rel (!%p15_p4) target bundleno = 5 (0x5), region = 97 }
 0x35a   :  { %4083 = vsyncpa [#allocation4], 1 }
 0x35b   :  { %4085 = vsyncpa [#allocation4 + $0x1], 1 }
 0x35c   :  { %4086 = vsyncpa [#allocation7], 1 }
 0x35d   :  { %4088 = vsyncpa [#allocation7 + $0x1], 1 }
 0x35e   :  { %4089 = vsyncpa [#allocation5], 1 }
 0x35f   :  { %4091 = vsyncpa [#allocation5 + $0x1], 1 }

</bundles_post_ra>
